<compile_context>
chip_gen: v7x
topology: tpu7x:2x2x1
jax: 0.10.0
libtpu: 0.0.40
codegen_flags: <defaults>
</compile_context>

<pallas_src>
import functools
import math

import jax
import jax.numpy as jnp
from jax.experimental import pallas as pl
from jax.experimental.pallas import tpu as pltpu


# ----------------------------- Pallas kernel --------------------------------

def _graphconv_kernel(*refs, tm, has_skip, has_score, has_head, apply_relu):
    """Fused GraphConv (+ optional skip-add, TopK score, lin1+log_softmax)."""
    refs = list(refs)
    a_ref = refs.pop(0)                               # (tm, N)   f32 adjacency rows
    x_ref = refs.pop(0)                               # (N, Fin)  f32, fully resident
    skip_ref = refs.pop(0) if has_skip else None      # (N, Fin)  f32
    wn_ref = refs.pop(0)                              # (Fin, Fout) f32  W_nbr
    wr_ref = refs.pop(0)                              # (Fin, Fout) f32  W_root
    b_ref = refs.pop(0)                               # (1, Fout) f32
    p_ref = refs.pop(0) if has_score else None        # (1, Fout) f32
    wl_ref = refs.pop(0) if has_head else None        # (Fout, C) f32
    bl_ref = refs.pop(0) if has_head else None        # (1, C)    f32
    out_ref = refs.pop(0)                             # (tm, Fout) or (tm, C)
    score_ref = refs.pop(0) if has_score else None    # (tm, 1)   f32

    n, _ = x_ref.shape

    # full node features (needed for the neighbor aggregation A @ X)
    x_full = x_ref[...]
    if has_skip:
        x_full = x_full + skip_ref[...]               # Unpool skip-add fused here

    # rows of this output block (needed for the root term X @ W_root)
    if tm == n:
        x_rows = x_full
    else:
        row0 = pl.multiple_of(pl.program_id(0) * tm, tm)
        x_rows = x_ref[pl.ds(row0, tm), :]
        if has_skip:
            x_rows = x_rows + skip_ref[pl.ds(row0, tm), :]

    # neighbor aggregation on the MXU, f32 throughout
    agg = jnp.dot(a_ref[...], x_full, preferred_element_type=jnp.float32)

    out = (jnp.dot(agg, wn_ref[...], preferred_element_type=jnp.float32)
           + jnp.dot(x_rows, wr_ref[...], preferred_element_type=jnp.float32)
           + b_ref[...])
    if apply_relu:
        out = jnp.maximum(out, 0.0)

    if has_score:
        # TopKPooling attention score tanh((out . p) / ||p||), fused so the
        # conv output never round-trips through HBM. VPU mul + lane reduce.
        p = p_ref[...]
        inv_norm = jax.lax.rsqrt(jnp.sum(p * p, axis=-1, keepdims=True))
        score_ref[...] = jnp.tanh(
            jnp.sum(out * p, axis=-1, keepdims=True) * inv_norm)

    if has_head:
        # final Linear + log_softmax fused onto the last GraphConv
        logits = jnp.dot(out, wl_ref[...],
                         preferred_element_type=jnp.float32) + bl_ref[...]
        z = logits - jnp.max(logits, axis=-1, keepdims=True)
        lse = jnp.log(jnp.sum(jnp.exp(z), axis=-1, keepdims=True))
        out_ref[...] = z - lse
    else:
        out_ref[...] = out


def _pick_tm(n):
    # Row tile for the adjacency blocks. Multiples of 16 keep sublane packing
    # happy; fall back to the full extent (single grid step) when n has no
    # such divisor (e.g. the ragged sizes produced by TopK pooling).
    for t in (512, 256, 128, 64, 32, 16):
        if n % t == 0 and n // t >= 2:
            return t
    return n


def graph_conv(A, X, W_nbr, W_root, b, *, skip=None, p=None, head=None,
               relu=True):
    """relu(A @ X' @ W_nbr + X' @ W_root + b) with optional fused extras.

    X' = X + skip (Unpool skip-add), second output = TopK score when `p` is
    given, output replaced by log_softmax(lin(out)) when `head` is given.
    """
    n, f_in = X.shape
    f_out = W_nbr.shape[1]
    tm = _pick_tm(n)
    grid = (n // tm,)

    in_specs = [pl.BlockSpec((tm, n), lambda i: (i, 0)),       # A row block
                pl.BlockSpec((n, f_in), lambda i: (0, 0))]     # X resident
    args = [A, X]
    if skip is not None:
        in_specs.append(pl.BlockSpec((n, f_in), lambda i: (0, 0)))
        args.append(skip)
    in_specs += [pl.BlockSpec((f_in, f_out), lambda i: (0, 0)),
                 pl.BlockSpec((f_in, f_out), lambda i: (0, 0)),
                 pl.BlockSpec((1, f_out), lambda i: (0, 0))]
    args += [W_nbr, W_root, b]
    if p is not None:
        in_specs.append(pl.BlockSpec((1, f_out), lambda i: (0, 0)))
        args.append(p)
    if head is not None:
        w_lin, b_lin = head
        c = w_lin.shape[1]
        in_specs += [pl.BlockSpec((f_out, c), lambda i: (0, 0)),
                     pl.BlockSpec((1, c), lambda i: (0, 0))]
        args += [w_lin, b_lin]
        out_dim = c
    else:
        out_dim = f_out

    out_shapes = [jax.ShapeDtypeStruct((n, out_dim), jnp.float32)]
    out_specs = [pl.BlockSpec((tm, out_dim), lambda i: (i, 0))]
    if p is not None:
        # lane-width-1 score output is tiny and only ever produced fused with
        # a wide conv output (keeps launch count low, avoids an HBM re-read).
        out_shapes.append(jax.ShapeDtypeStruct((n, 1), jnp.float32))
        out_specs.append(pl.BlockSpec((tm, 1), lambda i: (i, 0)))

    kernel = functools.partial(
        _graphconv_kernel, tm=tm, has_skip=skip is not None,
        has_score=p is not None, has_head=head is not None, apply_relu=relu)

    return pl.pallas_call(
        kernel,
        grid=grid,
        out_shape=tuple(out_shapes) if len(out_shapes) > 1 else out_shapes[0],
        in_specs=in_specs,
        out_specs=tuple(out_specs) if len(out_specs) > 1 else out_specs[0],
        compiler_params=pltpu.CompilerParams(
            dimension_semantics=("parallel",)),
    )(*args)


# ----------------------------- glue (plain JAX) -----------------------------

def topk_pool_select(x, score_col, A, ratio):
    """TopKPooling selection given precomputed (fused) scores."""
    # TODO(synk): for large N, move the A[perm][:, perm] gather into a
    # PrefetchScalarGridSpec kernel (pl.Element index_map over perm) instead of
    # materializing the pooled adjacency in HBM.
    n = x.shape[0]
    k = int(math.ceil(ratio * n))
    score = score_col[:, 0]
    _, perm = jax.lax.top_k(score, k)
    x_pooled = x[perm] * score[perm][:, None]   # gate kept nodes by score
    A_pooled = A[perm][:, perm]                 # filter + relabel edges
    return x_pooled, A_pooled, perm


def unpool(x_down, n_up, perm):
    # TODO(synk): data-dependent scatter kept in plain JAX; the trailing skip
    # add is fused into the following GraphConv kernel instead.
    return jnp.zeros((n_up, x_down.shape[1]), x_down.dtype).at[perm].set(x_down)


# ------------------------------- the network --------------------------------

def init_params(key, feature_dim, hidden_dim, embed_dim, class_num):
    ks = jax.random.split(key, 16)

    def conv(k_nbr, k_root, fi, fo):
        s = 1.0 / math.sqrt(fi)
        w_nbr = s * jax.random.normal(k_nbr, (fi, fo), jnp.float32)
        w_root = s * jax.random.normal(k_root, (fi, fo), jnp.float32)
        return w_nbr, w_root, jnp.zeros((1, fo), jnp.float32)

    return {
        "conv1": conv(ks[0], ks[1], feature_dim, hidden_dim),
        "conv2": conv(ks[2], ks[3], hidden_dim, embed_dim),
        "conv3": conv(ks[4], ks[5], embed_dim, embed_dim),
        "conv4": conv(ks[6], ks[7], embed_dim, hidden_dim),
        "conv5": conv(ks[8], ks[9], hidden_dim, feature_dim),
        "pool1_p": jax.random.normal(ks[10], (1, hidden_dim), jnp.float32),
        "pool2_p": jax.random.normal(ks[11], (1, embed_dim), jnp.float32),
        "lin1_w": (1.0 / math.sqrt(feature_dim))
                  * jax.random.normal(ks[12], (feature_dim, class_num),
                                      jnp.float32),
        "lin1_b": 0.01 * jax.random.normal(ks[13], (1, class_num), jnp.float32),
    }


def net_forward(params, x, A):
    """Mirror of Net.forward. x: (N, feature_dim), A: (N, N) dense adjacency."""
    ratio = 0.8
    A0 = A.astype(jnp.float32)

    # conv1 + relu, pool1 score fused
    wn, wr, b = params["conv1"]
    x1, s1 = graph_conv(A0, x, wn, wr, b, p=params["pool1_p"])
    xp1, A1, perm1 = topk_pool_select(x1, s1, A0, ratio)

    # conv2 + relu, pool2 score fused
    wn, wr, b = params["conv2"]
    x2, s2 = graph_conv(A1, xp1, wn, wr, b, p=params["pool2_p"])
    xp2, A2, perm2 = topk_pool_select(x2, s2, A1, ratio)

    # conv3 + relu
    wn, wr, b = params["conv3"]
    x3 = graph_conv(A2, xp2, wn, wr, b)

    # Unpool1 (scatter); "+ x2" skip is fused into conv4
    u1 = unpool(x3, x2.shape[0], perm2)
    wn, wr, b = params["conv4"]
    x4 = graph_conv(A1, u1, wn, wr, b, skip=x2)

    # Unpool2 (scatter); "+ x1" skip, lin1 and log_softmax fused into conv5
    u2 = unpool(x4, x1.shape[0], perm1)
    wn, wr, b = params["conv5"]
    out = graph_conv(A0, u2, wn, wr, b, skip=x1,
                     head=(params["lin1_w"], params["lin1_b"]))
    return out


# --------------------------------- driver -----------------------------------

if __name__ == "__main__":
    feature_dim, hidden_dim, embed_dim, class_num = 8, 32, 16, 4
    num_nodes = 64   # small, but big enough to exercise the row-tiled grid

    key = jax.random.PRNGKey(0)
    k_param, k_x, k_adj = jax.random.split(key, 3)

    params = init_params(k_param, feature_dim, hidden_dim, embed_dim, class_num)

    # node features (N, feature_dim)
    x = jax.random.normal(k_x, (num_nodes, feature_dim), jnp.float32)

    # dense adjacency A[target, source] = 1.0, no self loops
    A = (jax.random.uniform(k_adj, (num_nodes, num_nodes)) < 0.2).astype(jnp.float32)
    A = A * (1.0 - jnp.eye(num_nodes, dtype=jnp.float32))

    fwd = jax.jit(functools.partial(net_forward, params))
    out = fwd(x, A)
    jax.block_until_ready(out)

    assert out.shape == (num_nodes, class_num)
    # rows of log_softmax should exponentiate-sum to ~1
    assert bool(jnp.allclose(jnp.sum(jnp.exp(out), axis=-1), 1.0, atol=1e-4))
    print("KERNEL_OK")
</pallas_src>

<mosaic_0001>
module attributes {stable_mosaic.version = 11 : i64} {
  func.func @_graphconv_kernel(%arg0: i32, %arg1: memref<32x64xf32, #tpu.memory_space<vmem>>, %arg2: memref<64x8xf32, #tpu.memory_space<vmem>>, %arg3: memref<8x32xf32, #tpu.memory_space<vmem>>, %arg4: memref<8x32xf32, #tpu.memory_space<vmem>>, %arg5: memref<1x32xf32, #tpu.memory_space<vmem>>, %arg6: memref<1x32xf32, #tpu.memory_space<vmem>>, %arg7: memref<32x32xf32, #tpu.memory_space<vmem>>, %arg8: memref<32x1xf32, #tpu.memory_space<vmem>>) attributes {dimension_semantics = [#tpu.dimension_semantics<parallel>], iteration_bounds = array<i64: 2>, scalar_prefetch = 0 : i64, scratch_operands = 0 : i64, tpu.core_type = #tpu.core_type<tc>, window_params = [{transform_indices = @transform_0, window_bounds = array<i64: 32, 64>}, {pipeline_mode = #tpu.pipeline_mode<synchronous>, transform_indices = @transform_1, window_bounds = array<i64: 64, 8>}, {pipeline_mode = #tpu.pipeline_mode<synchronous>, transform_indices = @transform_2, window_bounds = array<i64: 8, 32>}, {pipeline_mode = #tpu.pipeline_mode<synchronous>, transform_indices = @transform_3, window_bounds = array<i64: 8, 32>}, {pipeline_mode = #tpu.pipeline_mode<synchronous>, transform_indices = @transform_4, window_bounds = array<i64: 1, 32>}, {pipeline_mode = #tpu.pipeline_mode<synchronous>, transform_indices = @transform_5, window_bounds = array<i64: 1, 32>}, {transform_indices = @transform_6, window_bounds = array<i64: 32, 32>}, {transform_indices = @transform_7, window_bounds = array<i64: 32, 1>}]} {
    %c0 = arith.constant 0 : index
    %c0_0 = arith.constant 0 : index
    %0 = vector.load %arg2[%c0, %c0_0] : memref<64x8xf32, #tpu.memory_space<vmem>>, vector<64x8xf32>
    %c32_i32 = arith.constant 32 : i32
    %1 = arith.muli %arg0, %c32_i32 : i32
    %2 = tpu.assume_multiple %1, 32 : i32
    %3 = arith.index_cast %2 : i32 to index
    %c0_1 = arith.constant 0 : index
    %4 = vector.load %arg2[%3, %c0_1] : memref<64x8xf32, #tpu.memory_space<vmem>>, vector<32x8xf32>
    %c0_2 = arith.constant 0 : index
    %c0_3 = arith.constant 0 : index
    %5 = vector.load %arg1[%c0_2, %c0_3] : memref<32x64xf32, #tpu.memory_space<vmem>>, vector<32x64xf32>
    %cst = arith.constant dense<0.000000e+00> : vector<32x8xf32>
    %6 = tpu.matmul %5, %0, %cst {dimension_numbers = #tpu.dot_dimension_numbers<[1], [0], [0], [1], [0, 0, 1, 1], [], []>} : vector<32x64xf32>, vector<64x8xf32>, vector<32x8xf32> -> vector<32x8xf32>
    %c0_4 = arith.constant 0 : index
    %c0_5 = arith.constant 0 : index
    %7 = vector.load %arg3[%c0_4, %c0_5] : memref<8x32xf32, #tpu.memory_space<vmem>>, vector<8x32xf32>
    %cst_6 = arith.constant dense<0.000000e+00> : vector<32x32xf32>
    %8 = tpu.matmul %6, %7, %cst_6 {dimension_numbers = #tpu.dot_dimension_numbers<[1], [0], [0], [1], [0, 0, 1, 1], [], []>} : vector<32x8xf32>, vector<8x32xf32>, vector<32x32xf32> -> vector<32x32xf32>
    %c0_7 = arith.constant 0 : index
    %c0_8 = arith.constant 0 : index
    %9 = vector.load %arg4[%c0_7, %c0_8] : memref<8x32xf32, #tpu.memory_space<vmem>>, vector<8x32xf32>
    %cst_9 = arith.constant dense<0.000000e+00> : vector<32x32xf32>
    %10 = tpu.matmul %4, %9, %cst_9 {dimension_numbers = #tpu.dot_dimension_numbers<[1], [0], [0], [1], [0, 0, 1, 1], [], []>} : vector<32x8xf32>, vector<8x32xf32>, vector<32x32xf32> -> vector<32x32xf32>
    %11 = arith.addf %8, %10 : vector<32x32xf32>
    %c0_10 = arith.constant 0 : index
    %c0_11 = arith.constant 0 : index
    %12 = vector.load %arg5[%c0_10, %c0_11] : memref<1x32xf32, #tpu.memory_space<vmem>>, vector<1x32xf32>
    %13 = vector.broadcast %12 : vector<1x32xf32> to vector<32x32xf32>
    %14 = arith.addf %11, %13 : vector<32x32xf32>
    %cst_12 = arith.constant 0.000000e+00 : f32
    %15 = vector.broadcast %cst_12 : f32 to vector<32x32xf32>
    %16 = arith.maximumf %14, %15 : vector<32x32xf32>
    %c0_13 = arith.constant 0 : index
    %c0_14 = arith.constant 0 : index
    %17 = vector.load %arg6[%c0_13, %c0_14] : memref<1x32xf32, #tpu.memory_space<vmem>>, vector<1x32xf32>
    %18 = arith.mulf %17, %17 : vector<1x32xf32>
    %cst_15 = arith.constant dense<0.000000e+00> : vector<1xf32>
    %19 = vector.multi_reduction <add>, %18, %cst_15 [1] : vector<1x32xf32> to vector<1xf32>
    %20 = vector.shape_cast %19 : vector<1xf32> to vector<1x1xf32>
    %21 = math.rsqrt %20 : vector<1x1xf32>
    %22 = vector.broadcast %17 : vector<1x32xf32> to vector<32x32xf32>
    %23 = arith.mulf %16, %22 : vector<32x32xf32>
    %cst_16 = arith.constant dense<0.000000e+00> : vector<32xf32>
    %24 = vector.multi_reduction <add>, %23, %cst_16 [1] : vector<32x32xf32> to vector<32xf32>
    %25 = vector.shape_cast %24 : vector<32xf32> to vector<32x1xf32>
    %26 = vector.broadcast %21 : vector<1x1xf32> to vector<32x1xf32>
    %27 = arith.mulf %25, %26 : vector<32x1xf32>
    %28 = math.tanh %27 : vector<32x1xf32>
    %c0_17 = arith.constant 0 : index
    %c0_18 = arith.constant 0 : index
    %29 = vector.load %arg8[%c0_17, %c0_18] : memref<32x1xf32, #tpu.memory_space<vmem>>, vector<32x1xf32>
    tpu.vector_store %arg8[%c0_17, %c0_18], %28 {strides = array<i32>} : memref<32x1xf32, #tpu.memory_space<vmem>>, vector<32x1xf32>,
    %c0_19 = arith.constant 0 : index
    %c0_20 = arith.constant 0 : index
    %30 = vector.load %arg7[%c0_19, %c0_20] : memref<32x32xf32, #tpu.memory_space<vmem>>, vector<32x32xf32>
    tpu.vector_store %arg7[%c0_19, %c0_20], %16 {strides = array<i32>} : memref<32x32xf32, #tpu.memory_space<vmem>>, vector<32x32xf32>,
    return
  }
  func.func @transform_0(%arg0: i32) -> (i32, i32) {
    %c0_i32 = arith.constant 0 : i32
    %c0_i32_0 = arith.constant 0 : i32
    return %arg0, %c0_i32 : i32, i32
  }
  func.func @transform_1(%arg0: i32) -> (i32, i32) {
    %c0_i32 = arith.constant 0 : i32
    %c0_i32_0 = arith.constant 0 : i32
    %c0_i32_1 = arith.constant 0 : i32
    return %c0_i32, %c0_i32_0 : i32, i32
  }
  func.func @transform_2(%arg0: i32) -> (i32, i32) {
    %c0_i32 = arith.constant 0 : i32
    %c0_i32_0 = arith.constant 0 : i32
    %c0_i32_1 = arith.constant 0 : i32
    return %c0_i32, %c0_i32_0 : i32, i32
  }
  func.func @transform_3(%arg0: i32) -> (i32, i32) {
    %c0_i32 = arith.constant 0 : i32
    %c0_i32_0 = arith.constant 0 : i32
    %c0_i32_1 = arith.constant 0 : i32
    return %c0_i32, %c0_i32_0 : i32, i32
  }
  func.func @transform_4(%arg0: i32) -> (i32, i32) {
    %c0_i32 = arith.constant 0 : i32
    %c0_i32_0 = arith.constant 0 : i32
    %c0_i32_1 = arith.constant 0 : i32
    return %c0_i32, %c0_i32_0 : i32, i32
  }
  func.func @transform_5(%arg0: i32) -> (i32, i32) {
    %c0_i32 = arith.constant 0 : i32
    %c0_i32_0 = arith.constant 0 : i32
    %c0_i32_1 = arith.constant 0 : i32
    return %c0_i32, %c0_i32_0 : i32, i32
  }
  func.func @transform_6(%arg0: i32) -> (i32, i32) {
    %c0_i32 = arith.constant 0 : i32
    %c0_i32_0 = arith.constant 0 : i32
    return %arg0, %c0_i32 : i32, i32
  }
  func.func @transform_7(%arg0: i32) -> (i32, i32) {
    %c0_i32 = arith.constant 0 : i32
    %c0_i32_0 = arith.constant 0 : i32
    return %arg0, %c0_i32 : i32, i32
  }
}

module attributes {stable_mosaic.version = 11 : i64} {
  func.func @_graphconv_kernel(%arg0: i32, %arg1: memref<52x52xf32, #tpu.memory_space<vmem>>, %arg2: memref<52x32xf32, #tpu.memory_space<vmem>>, %arg3: memref<32x16xf32, #tpu.memory_space<vmem>>, %arg4: memref<32x16xf32, #tpu.memory_space<vmem>>, %arg5: memref<1x16xf32, #tpu.memory_space<vmem>>, %arg6: memref<1x16xf32, #tpu.memory_space<vmem>>, %arg7: memref<52x16xf32, #tpu.memory_space<vmem>>, %arg8: memref<52x1xf32, #tpu.memory_space<vmem>>) attributes {dimension_semantics = [#tpu.dimension_semantics<parallel>], iteration_bounds = array<i64: 1>, scalar_prefetch = 0 : i64, scratch_operands = 0 : i64, tpu.core_type = #tpu.core_type<tc>, window_params = [{transform_indices = @transform_0, window_bounds = array<i64: 52, 52>}, {pipeline_mode = #tpu.pipeline_mode<synchronous>, transform_indices = @transform_1, window_bounds = array<i64: 52, 32>}, {pipeline_mode = #tpu.pipeline_mode<synchronous>, transform_indices = @transform_2, window_bounds = array<i64: 32, 16>}, {pipeline_mode = #tpu.pipeline_mode<synchronous>, transform_indices = @transform_3, window_bounds = array<i64: 32, 16>}, {pipeline_mode = #tpu.pipeline_mode<synchronous>, transform_indices = @transform_4, window_bounds = array<i64: 1, 16>}, {pipeline_mode = #tpu.pipeline_mode<synchronous>, transform_indices = @transform_5, window_bounds = array<i64: 1, 16>}, {transform_indices = @transform_6, window_bounds = array<i64: 52, 16>}, {transform_indices = @transform_7, window_bounds = array<i64: 52, 1>}]} {
    %c0 = arith.constant 0 : index
    %c0_0 = arith.constant 0 : index
    %0 = vector.load %arg2[%c0, %c0_0] : memref<52x32xf32, #tpu.memory_space<vmem>>, vector<52x32xf32>
    %c0_1 = arith.constant 0 : index
    %c0_2 = arith.constant 0 : index
    %1 = vector.load %arg1[%c0_1, %c0_2] : memref<52x52xf32, #tpu.memory_space<vmem>>, vector<52x52xf32>
    %cst = arith.constant dense<0.000000e+00> : vector<52x32xf32>
    %2 = tpu.matmul %1, %0, %cst {dimension_numbers = #tpu.dot_dimension_numbers<[1], [0], [0], [1], [0, 0, 1, 1], [], []>} : vector<52x52xf32>, vector<52x32xf32>, vector<52x32xf32> -> vector<52x32xf32>
    %c0_3 = arith.constant 0 : index
    %c0_4 = arith.constant 0 : index
    %3 = vector.load %arg3[%c0_3, %c0_4] : memref<32x16xf32, #tpu.memory_space<vmem>>, vector<32x16xf32>
    %cst_5 = arith.constant dense<0.000000e+00> : vector<52x16xf32>
    %4 = tpu.matmul %2, %3, %cst_5 {dimension_numbers = #tpu.dot_dimension_numbers<[1], [0], [0], [1], [0, 0, 1, 1], [], []>} : vector<52x32xf32>, vector<32x16xf32>, vector<52x16xf32> -> vector<52x16xf32>
    %c0_6 = arith.constant 0 : index
    %c0_7 = arith.constant 0 : index
    %5 = vector.load %arg4[%c0_6, %c0_7] : memref<32x16xf32, #tpu.memory_space<vmem>>, vector<32x16xf32>
    %cst_8 = arith.constant dense<0.000000e+00> : vector<52x16xf32>
    %6 = tpu.matmul %0, %5, %cst_8 {dimension_numbers = #tpu.dot_dimension_numbers<[1], [0], [0], [1], [0, 0, 1, 1], [], []>} : vector<52x32xf32>, vector<32x16xf32>, vector<52x16xf32> -> vector<52x16xf32>
    %7 = arith.addf %4, %6 : vector<52x16xf32>
    %c0_9 = arith.constant 0 : index
    %c0_10 = arith.constant 0 : index
    %8 = vector.load %arg5[%c0_9, %c0_10] : memref<1x16xf32, #tpu.memory_space<vmem>>, vector<1x16xf32>
    %9 = vector.broadcast %8 : vector<1x16xf32> to vector<52x16xf32>
    %10 = arith.addf %7, %9 : vector<52x16xf32>
    %cst_11 = arith.constant 0.000000e+00 : f32
    %11 = vector.broadcast %cst_11 : f32 to vector<52x16xf32>
    %12 = arith.maximumf %10, %11 : vector<52x16xf32>
    %c0_12 = arith.constant 0 : index
    %c0_13 = arith.constant 0 : index
    %13 = vector.load %arg6[%c0_12, %c0_13] : memref<1x16xf32, #tpu.memory_space<vmem>>, vector<1x16xf32>
    %14 = arith.mulf %13, %13 : vector<1x16xf32>
    %cst_14 = arith.constant dense<0.000000e+00> : vector<1xf32>
    %15 = vector.multi_reduction <add>, %14, %cst_14 [1] : vector<1x16xf32> to vector<1xf32>
    %16 = vector.shape_cast %15 : vector<1xf32> to vector<1x1xf32>
    %17 = math.rsqrt %16 : vector<1x1xf32>
    %18 = vector.broadcast %13 : vector<1x16xf32> to vector<52x16xf32>
    %19 = arith.mulf %12, %18 : vector<52x16xf32>
    %cst_15 = arith.constant dense<0.000000e+00> : vector<52xf32>
    %20 = vector.multi_reduction <add>, %19, %cst_15 [1] : vector<52x16xf32> to vector<52xf32>
    %21 = vector.shape_cast %20 : vector<52xf32> to vector<52x1xf32>
    %22 = vector.broadcast %17 : vector<1x1xf32> to vector<52x1xf32>
    %23 = arith.mulf %21, %22 : vector<52x1xf32>
    %24 = math.tanh %23 : vector<52x1xf32>
    %c0_16 = arith.constant 0 : index
    %c0_17 = arith.constant 0 : index
    %25 = vector.load %arg8[%c0_16, %c0_17] : memref<52x1xf32, #tpu.memory_space<vmem>>, vector<52x1xf32>
    tpu.vector_store %arg8[%c0_16, %c0_17], %24 {strides = array<i32>} : memref<52x1xf32, #tpu.memory_space<vmem>>, vector<52x1xf32>,
    %c0_18 = arith.constant 0 : index
    %c0_19 = arith.constant 0 : index
    %26 = vector.load %arg7[%c0_18, %c0_19] : memref<52x16xf32, #tpu.memory_space<vmem>>, vector<52x16xf32>
    tpu.vector_store %arg7[%c0_18, %c0_19], %12 {strides = array<i32>} : memref<52x16xf32, #tpu.memory_space<vmem>>, vector<52x16xf32>,
    return
  }
  func.func @transform_0(%arg0: i32) -> (i32, i32) {
    %c0_i32 = arith.constant 0 : i32
    %c0_i32_0 = arith.constant 0 : i32
    return %arg0, %c0_i32 : i32, i32
  }
  func.func @transform_1(%arg0: i32) -> (i32, i32) {
    %c0_i32 = arith.constant 0 : i32
    %c0_i32_0 = arith.constant 0 : i32
    %c0_i32_1 = arith.constant 0 : i32
    return %c0_i32, %c0_i32_0 : i32, i32
  }
  func.func @transform_2(%arg0: i32) -> (i32, i32) {
    %c0_i32 = arith.constant 0 : i32
    %c0_i32_0 = arith.constant 0 : i32
    %c0_i32_1 = arith.constant 0 : i32
    return %c0_i32, %c0_i32_0 : i32, i32
  }
  func.func @transform_3(%arg0: i32) -> (i32, i32) {
    %c0_i32 = arith.constant 0 : i32
    %c0_i32_0 = arith.constant 0 : i32
    %c0_i32_1 = arith.constant 0 : i32
    return %c0_i32, %c0_i32_0 : i32, i32
  }
  func.func @transform_4(%arg0: i32) -> (i32, i32) {
    %c0_i32 = arith.constant 0 : i32
    %c0_i32_0 = arith.constant 0 : i32
    %c0_i32_1 = arith.constant 0 : i32
    return %c0_i32, %c0_i32_0 : i32, i32
  }
  func.func @transform_5(%arg0: i32) -> (i32, i32) {
    %c0_i32 = arith.constant 0 : i32
    %c0_i32_0 = arith.constant 0 : i32
    %c0_i32_1 = arith.constant 0 : i32
    return %c0_i32, %c0_i32_0 : i32, i32
  }
  func.func @transform_6(%arg0: i32) -> (i32, i32) {
    %c0_i32 = arith.constant 0 : i32
    %c0_i32_0 = arith.constant 0 : i32
    return %arg0, %c0_i32 : i32, i32
  }
  func.func @transform_7(%arg0: i32) -> (i32, i32) {
    %c0_i32 = arith.constant 0 : i32
    %c0_i32_0 = arith.constant 0 : i32
    return %arg0, %c0_i32 : i32, i32
  }
}

module attributes {stable_mosaic.version = 11 : i64} {
  func.func @_graphconv_kernel(%arg0: i32, %arg1: memref<42x42xf32, #tpu.memory_space<vmem>>, %arg2: memref<42x16xf32, #tpu.memory_space<vmem>>, %arg3: memref<16x16xf32, #tpu.memory_space<vmem>>, %arg4: memref<16x16xf32, #tpu.memory_space<vmem>>, %arg5: memref<1x16xf32, #tpu.memory_space<vmem>>, %arg6: memref<42x16xf32, #tpu.memory_space<vmem>>) attributes {dimension_semantics = [#tpu.dimension_semantics<parallel>], iteration_bounds = array<i64: 1>, scalar_prefetch = 0 : i64, scratch_operands = 0 : i64, tpu.core_type = #tpu.core_type<tc>, window_params = [{transform_indices = @transform_0, window_bounds = array<i64: 42, 42>}, {pipeline_mode = #tpu.pipeline_mode<synchronous>, transform_indices = @transform_1, window_bounds = array<i64: 42, 16>}, {pipeline_mode = #tpu.pipeline_mode<synchronous>, transform_indices = @transform_2, window_bounds = array<i64: 16, 16>}, {pipeline_mode = #tpu.pipeline_mode<synchronous>, transform_indices = @transform_3, window_bounds = array<i64: 16, 16>}, {pipeline_mode = #tpu.pipeline_mode<synchronous>, transform_indices = @transform_4, window_bounds = array<i64: 1, 16>}, {transform_indices = @transform_5, window_bounds = array<i64: 42, 16>}]} {
    %c0 = arith.constant 0 : index
    %c0_0 = arith.constant 0 : index
    %0 = vector.load %arg2[%c0, %c0_0] : memref<42x16xf32, #tpu.memory_space<vmem>>, vector<42x16xf32>
    %c0_1 = arith.constant 0 : index
    %c0_2 = arith.constant 0 : index
    %1 = vector.load %arg1[%c0_1, %c0_2] : memref<42x42xf32, #tpu.memory_space<vmem>>, vector<42x42xf32>
    %cst = arith.constant dense<0.000000e+00> : vector<42x16xf32>
    %2 = tpu.matmul %1, %0, %cst {dimension_numbers = #tpu.dot_dimension_numbers<[1], [0], [0], [1], [0, 0, 1, 1], [], []>} : vector<42x42xf32>, vector<42x16xf32>, vector<42x16xf32> -> vector<42x16xf32>
    %c0_3 = arith.constant 0 : index
    %c0_4 = arith.constant 0 : index
    %3 = vector.load %arg3[%c0_3, %c0_4] : memref<16x16xf32, #tpu.memory_space<vmem>>, vector<16x16xf32>
    %cst_5 = arith.constant dense<0.000000e+00> : vector<42x16xf32>
    %4 = tpu.matmul %2, %3, %cst_5 {dimension_numbers = #tpu.dot_dimension_numbers<[1], [0], [0], [1], [0, 0, 1, 1], [], []>} : vector<42x16xf32>, vector<16x16xf32>, vector<42x16xf32> -> vector<42x16xf32>
    %c0_6 = arith.constant 0 : index
    %c0_7 = arith.constant 0 : index
    %5 = vector.load %arg4[%c0_6, %c0_7] : memref<16x16xf32, #tpu.memory_space<vmem>>, vector<16x16xf32>
    %cst_8 = arith.constant dense<0.000000e+00> : vector<42x16xf32>
    %6 = tpu.matmul %0, %5, %cst_8 {dimension_numbers = #tpu.dot_dimension_numbers<[1], [0], [0], [1], [0, 0, 1, 1], [], []>} : vector<42x16xf32>, vector<16x16xf32>, vector<42x16xf32> -> vector<42x16xf32>
    %7 = arith.addf %4, %6 : vector<42x16xf32>
    %c0_9 = arith.constant 0 : index
    %c0_10 = arith.constant 0 : index
    %8 = vector.load %arg5[%c0_9, %c0_10] : memref<1x16xf32, #tpu.memory_space<vmem>>, vector<1x16xf32>
    %9 = vector.broadcast %8 : vector<1x16xf32> to vector<42x16xf32>
    %10 = arith.addf %7, %9 : vector<42x16xf32>
    %cst_11 = arith.constant 0.000000e+00 : f32
    %11 = vector.broadcast %cst_11 : f32 to vector<42x16xf32>
    %12 = arith.maximumf %10, %11 : vector<42x16xf32>
    %c0_12 = arith.constant 0 : index
    %c0_13 = arith.constant 0 : index
    %13 = vector.load %arg6[%c0_12, %c0_13] : memref<42x16xf32, #tpu.memory_space<vmem>>, vector<42x16xf32>
    tpu.vector_store %arg6[%c0_12, %c0_13], %12 {strides = array<i32>} : memref<42x16xf32, #tpu.memory_space<vmem>>, vector<42x16xf32>,
    return
  }
  func.func @transform_0(%arg0: i32) -> (i32, i32) {
    %c0_i32 = arith.constant 0 : i32
    %c0_i32_0 = arith.constant 0 : i32
    return %arg0, %c0_i32 : i32, i32
  }
  func.func @transform_1(%arg0: i32) -> (i32, i32) {
    %c0_i32 = arith.constant 0 : i32
    %c0_i32_0 = arith.constant 0 : i32
    %c0_i32_1 = arith.constant 0 : i32
    return %c0_i32, %c0_i32_0 : i32, i32
  }
  func.func @transform_2(%arg0: i32) -> (i32, i32) {
    %c0_i32 = arith.constant 0 : i32
    %c0_i32_0 = arith.constant 0 : i32
    %c0_i32_1 = arith.constant 0 : i32
    return %c0_i32, %c0_i32_0 : i32, i32
  }
  func.func @transform_3(%arg0: i32) -> (i32, i32) {
    %c0_i32 = arith.constant 0 : i32
    %c0_i32_0 = arith.constant 0 : i32
    %c0_i32_1 = arith.constant 0 : i32
    return %c0_i32, %c0_i32_0 : i32, i32
  }
  func.func @transform_4(%arg0: i32) -> (i32, i32) {
    %c0_i32 = arith.constant 0 : i32
    %c0_i32_0 = arith.constant 0 : i32
    %c0_i32_1 = arith.constant 0 : i32
    return %c0_i32, %c0_i32_0 : i32, i32
  }
  func.func @transform_5(%arg0: i32) -> (i32, i32) {
    %c0_i32 = arith.constant 0 : i32
    %c0_i32_0 = arith.constant 0 : i32
    return %arg0, %c0_i32 : i32, i32
  }
}

module attributes {stable_mosaic.version = 11 : i64} {
  func.func @_graphconv_kernel(%arg0: i32, %arg1: memref<52x52xf32, #tpu.memory_space<vmem>>, %arg2: memref<52x16xf32, #tpu.memory_space<vmem>>, %arg3: memref<52x16xf32, #tpu.memory_space<vmem>>, %arg4: memref<16x32xf32, #tpu.memory_space<vmem>>, %arg5: memref<16x32xf32, #tpu.memory_space<vmem>>, %arg6: memref<1x32xf32, #tpu.memory_space<vmem>>, %arg7: memref<52x32xf32, #tpu.memory_space<vmem>>) attributes {dimension_semantics = [#tpu.dimension_semantics<parallel>], iteration_bounds = array<i64: 1>, scalar_prefetch = 0 : i64, scratch_operands = 0 : i64, tpu.core_type = #tpu.core_type<tc>, window_params = [{transform_indices = @transform_0, window_bounds = array<i64: 52, 52>}, {pipeline_mode = #tpu.pipeline_mode<synchronous>, transform_indices = @transform_1, window_bounds = array<i64: 52, 16>}, {pipeline_mode = #tpu.pipeline_mode<synchronous>, transform_indices = @transform_2, window_bounds = array<i64: 52, 16>}, {pipeline_mode = #tpu.pipeline_mode<synchronous>, transform_indices = @transform_3, window_bounds = array<i64: 16, 32>}, {pipeline_mode = #tpu.pipeline_mode<synchronous>, transform_indices = @transform_4, window_bounds = array<i64: 16, 32>}, {pipeline_mode = #tpu.pipeline_mode<synchronous>, transform_indices = @transform_5, window_bounds = array<i64: 1, 32>}, {transform_indices = @transform_6, window_bounds = array<i64: 52, 32>}]} {
    %c0 = arith.constant 0 : index
    %c0_0 = arith.constant 0 : index
    %0 = vector.load %arg2[%c0, %c0_0] : memref<52x16xf32, #tpu.memory_space<vmem>>, vector<52x16xf32>
    %c0_1 = arith.constant 0 : index
    %c0_2 = arith.constant 0 : index
    %1 = vector.load %arg3[%c0_1, %c0_2] : memref<52x16xf32, #tpu.memory_space<vmem>>, vector<52x16xf32>
    %2 = arith.addf %0, %1 : vector<52x16xf32>
    %c0_3 = arith.constant 0 : index
    %c0_4 = arith.constant 0 : index
    %3 = vector.load %arg1[%c0_3, %c0_4] : memref<52x52xf32, #tpu.memory_space<vmem>>, vector<52x52xf32>
    %cst = arith.constant dense<0.000000e+00> : vector<52x16xf32>
    %4 = tpu.matmul %3, %2, %cst {dimension_numbers = #tpu.dot_dimension_numbers<[1], [0], [0], [1], [0, 0, 1, 1], [], []>} : vector<52x52xf32>, vector<52x16xf32>, vector<52x16xf32> -> vector<52x16xf32>
    %c0_5 = arith.constant 0 : index
    %c0_6 = arith.constant 0 : index
    %5 = vector.load %arg4[%c0_5, %c0_6] : memref<16x32xf32, #tpu.memory_space<vmem>>, vector<16x32xf32>
    %cst_7 = arith.constant dense<0.000000e+00> : vector<52x32xf32>
    %6 = tpu.matmul %4, %5, %cst_7 {dimension_numbers = #tpu.dot_dimension_numbers<[1], [0], [0], [1], [0, 0, 1, 1], [], []>} : vector<52x16xf32>, vector<16x32xf32>, vector<52x32xf32> -> vector<52x32xf32>
    %c0_8 = arith.constant 0 : index
    %c0_9 = arith.constant 0 : index
    %7 = vector.load %arg5[%c0_8, %c0_9] : memref<16x32xf32, #tpu.memory_space<vmem>>, vector<16x32xf32>
    %cst_10 = arith.constant dense<0.000000e+00> : vector<52x32xf32>
    %8 = tpu.matmul %2, %7, %cst_10 {dimension_numbers = #tpu.dot_dimension_numbers<[1], [0], [0], [1], [0, 0, 1, 1], [], []>} : vector<52x16xf32>, vector<16x32xf32>, vector<52x32xf32> -> vector<52x32xf32>
    %9 = arith.addf %6, %8 : vector<52x32xf32>
    %c0_11 = arith.constant 0 : index
    %c0_12 = arith.constant 0 : index
    %10 = vector.load %arg6[%c0_11, %c0_12] : memref<1x32xf32, #tpu.memory_space<vmem>>, vector<1x32xf32>
    %11 = vector.broadcast %10 : vector<1x32xf32> to vector<52x32xf32>
    %12 = arith.addf %9, %11 : vector<52x32xf32>
    %cst_13 = arith.constant 0.000000e+00 : f32
    %13 = vector.broadcast %cst_13 : f32 to vector<52x32xf32>
    %14 = arith.maximumf %12, %13 : vector<52x32xf32>
    %c0_14 = arith.constant 0 : index
    %c0_15 = arith.constant 0 : index
    %15 = vector.load %arg7[%c0_14, %c0_15] : memref<52x32xf32, #tpu.memory_space<vmem>>, vector<52x32xf32>
    tpu.vector_store %arg7[%c0_14, %c0_15], %14 {strides = array<i32>} : memref<52x32xf32, #tpu.memory_space<vmem>>, vector<52x32xf32>,
    return
  }
  func.func @transform_0(%arg0: i32) -> (i32, i32) {
    %c0_i32 = arith.constant 0 : i32
    %c0_i32_0 = arith.constant 0 : i32
    return %arg0, %c0_i32 : i32, i32
  }
  func.func @transform_1(%arg0: i32) -> (i32, i32) {
    %c0_i32 = arith.constant 0 : i32
    %c0_i32_0 = arith.constant 0 : i32
    %c0_i32_1 = arith.constant 0 : i32
    return %c0_i32, %c0_i32_0 : i32, i32
  }
  func.func @transform_2(%arg0: i32) -> (i32, i32) {
    %c0_i32 = arith.constant 0 : i32
    %c0_i32_0 = arith.constant 0 : i32
    %c0_i32_1 = arith.constant 0 : i32
    return %c0_i32, %c0_i32_0 : i32, i32
  }
  func.func @transform_3(%arg0: i32) -> (i32, i32) {
    %c0_i32 = arith.constant 0 : i32
    %c0_i32_0 = arith.constant 0 : i32
    %c0_i32_1 = arith.constant 0 : i32
    return %c0_i32, %c0_i32_0 : i32, i32
  }
  func.func @transform_4(%arg0: i32) -> (i32, i32) {
    %c0_i32 = arith.constant 0 : i32
    %c0_i32_0 = arith.constant 0 : i32
    %c0_i32_1 = arith.constant 0 : i32
    return %c0_i32, %c0_i32_0 : i32, i32
  }
  func.func @transform_5(%arg0: i32) -> (i32, i32) {
    %c0_i32 = arith.constant 0 : i32
    %c0_i32_0 = arith.constant 0 : i32
    %c0_i32_1 = arith.constant 0 : i32
    return %c0_i32, %c0_i32_0 : i32, i32
  }
  func.func @transform_6(%arg0: i32) -> (i32, i32) {
    %c0_i32 = arith.constant 0 : i32
    %c0_i32_0 = arith.constant 0 : i32
    return %arg0, %c0_i32 : i32, i32
  }
}

module attributes {stable_mosaic.version = 11 : i64} {
  func.func @_graphconv_kernel(%arg0: i32, %arg1: memref<32x64xf32, #tpu.memory_space<vmem>>, %arg2: memref<64x32xf32, #tpu.memory_space<vmem>>, %arg3: memref<64x32xf32, #tpu.memory_space<vmem>>, %arg4: memref<32x8xf32, #tpu.memory_space<vmem>>, %arg5: memref<32x8xf32, #tpu.memory_space<vmem>>, %arg6: memref<1x8xf32, #tpu.memory_space<vmem>>, %arg7: memref<8x4xf32, #tpu.memory_space<vmem>>, %arg8: memref<1x4xf32, #tpu.memory_space<vmem>>, %arg9: memref<32x4xf32, #tpu.memory_space<vmem>>) attributes {dimension_semantics = [#tpu.dimension_semantics<parallel>], iteration_bounds = array<i64: 2>, scalar_prefetch = 0 : i64, scratch_operands = 0 : i64, tpu.core_type = #tpu.core_type<tc>, window_params = [{transform_indices = @transform_0, window_bounds = array<i64: 32, 64>}, {pipeline_mode = #tpu.pipeline_mode<synchronous>, transform_indices = @transform_1, window_bounds = array<i64: 64, 32>}, {pipeline_mode = #tpu.pipeline_mode<synchronous>, transform_indices = @transform_2, window_bounds = array<i64: 64, 32>}, {pipeline_mode = #tpu.pipeline_mode<synchronous>, transform_indices = @transform_3, window_bounds = array<i64: 32, 8>}, {pipeline_mode = #tpu.pipeline_mode<synchronous>, transform_indices = @transform_4, window_bounds = array<i64: 32, 8>}, {pipeline_mode = #tpu.pipeline_mode<synchronous>, transform_indices = @transform_5, window_bounds = array<i64: 1, 8>}, {pipeline_mode = #tpu.pipeline_mode<synchronous>, transform_indices = @transform_6, window_bounds = array<i64: 8, 4>}, {pipeline_mode = #tpu.pipeline_mode<synchronous>, transform_indices = @transform_7, window_bounds = array<i64: 1, 4>}, {transform_indices = @transform_8, window_bounds = array<i64: 32, 4>}]} {
    %c0 = arith.constant 0 : index
    %c0_0 = arith.constant 0 : index
    %0 = vector.load %arg2[%c0, %c0_0] : memref<64x32xf32, #tpu.memory_space<vmem>>, vector<64x32xf32>
    %c0_1 = arith.constant 0 : index
    %c0_2 = arith.constant 0 : index
    %1 = vector.load %arg3[%c0_1, %c0_2] : memref<64x32xf32, #tpu.memory_space<vmem>>, vector<64x32xf32>
    %2 = arith.addf %0, %1 : vector<64x32xf32>
    %c32_i32 = arith.constant 32 : i32
    %3 = arith.muli %arg0, %c32_i32 : i32
    %4 = tpu.assume_multiple %3, 32 : i32
    %5 = arith.index_cast %4 : i32 to index
    %c0_3 = arith.constant 0 : index
    %6 = vector.load %arg2[%5, %c0_3] : memref<64x32xf32, #tpu.memory_space<vmem>>, vector<32x32xf32>
    %7 = arith.index_cast %4 : i32 to index
    %c0_4 = arith.constant 0 : index
    %8 = vector.load %arg3[%7, %c0_4] : memref<64x32xf32, #tpu.memory_space<vmem>>, vector<32x32xf32>
    %9 = arith.addf %6, %8 : vector<32x32xf32>
    %c0_5 = arith.constant 0 : index
    %c0_6 = arith.constant 0 : index
    %10 = vector.load %arg1[%c0_5, %c0_6] : memref<32x64xf32, #tpu.memory_space<vmem>>, vector<32x64xf32>
    %cst = arith.constant dense<0.000000e+00> : vector<32x32xf32>
    %11 = tpu.matmul %10, %2, %cst {dimension_numbers = #tpu.dot_dimension_numbers<[1], [0], [0], [1], [0, 0, 1, 1], [], []>} : vector<32x64xf32>, vector<64x32xf32>, vector<32x32xf32> -> vector<32x32xf32>
    %c0_7 = arith.constant 0 : index
    %c0_8 = arith.constant 0 : index
    %12 = vector.load %arg4[%c0_7, %c0_8] : memref<32x8xf32, #tpu.memory_space<vmem>>, vector<32x8xf32>
    %cst_9 = arith.constant dense<0.000000e+00> : vector<32x8xf32>
    %13 = tpu.matmul %11, %12, %cst_9 {dimension_numbers = #tpu.dot_dimension_numbers<[1], [0], [0], [1], [0, 0, 1, 1], [], []>} : vector<32x32xf32>, vector<32x8xf32>, vector<32x8xf32> -> vector<32x8xf32>
    %c0_10 = arith.constant 0 : index
    %c0_11 = arith.constant 0 : index
    %14 = vector.load %arg5[%c0_10, %c0_11] : memref<32x8xf32, #tpu.memory_space<vmem>>, vector<32x8xf32>
    %cst_12 = arith.constant dense<0.000000e+00> : vector<32x8xf32>
    %15 = tpu.matmul %9, %14, %cst_12 {dimension_numbers = #tpu.dot_dimension_numbers<[1], [0], [0], [1], [0, 0, 1, 1], [], []>} : vector<32x32xf32>, vector<32x8xf32>, vector<32x8xf32> -> vector<32x8xf32>
    %16 = arith.addf %13, %15 : vector<32x8xf32>
    %c0_13 = arith.constant 0 : index
    %c0_14 = arith.constant 0 : index
    %17 = vector.load %arg6[%c0_13, %c0_14] : memref<1x8xf32, #tpu.memory_space<vmem>>, vector<1x8xf32>
    %18 = vector.broadcast %17 : vector<1x8xf32> to vector<32x8xf32>
    %19 = arith.addf %16, %18 : vector<32x8xf32>
    %cst_15 = arith.constant 0.000000e+00 : f32
    %20 = vector.broadcast %cst_15 : f32 to vector<32x8xf32>
    %21 = arith.maximumf %19, %20 : vector<32x8xf32>
    %c0_16 = arith.constant 0 : index
    %c0_17 = arith.constant 0 : index
    %22 = vector.load %arg7[%c0_16, %c0_17] : memref<8x4xf32, #tpu.memory_space<vmem>>, vector<8x4xf32>
    %cst_18 = arith.constant dense<0.000000e+00> : vector<32x4xf32>
    %23 = tpu.matmul %21, %22, %cst_18 {dimension_numbers = #tpu.dot_dimension_numbers<[1], [0], [0], [1], [0, 0, 1, 1], [], []>} : vector<32x8xf32>, vector<8x4xf32>, vector<32x4xf32> -> vector<32x4xf32>
    %c0_19 = arith.constant 0 : index
    %c0_20 = arith.constant 0 : index
    %24 = vector.load %arg8[%c0_19, %c0_20] : memref<1x4xf32, #tpu.memory_space<vmem>>, vector<1x4xf32>
    %25 = vector.broadcast %24 : vector<1x4xf32> to vector<32x4xf32>
    %26 = arith.addf %23, %25 : vector<32x4xf32>
    %cst_21 = arith.constant dense<0xFF800000> : vector<32xf32>
    %27 = vector.multi_reduction <maximumf>, %26, %cst_21 [1] : vector<32x4xf32> to vector<32xf32>
    %28 = vector.shape_cast %27 : vector<32xf32> to vector<32x1xf32>
    %29 = vector.broadcast %28 : vector<32x1xf32> to vector<32x4xf32>
    %30 = arith.subf %26, %29 : vector<32x4xf32>
    %31 = math.exp %30 : vector<32x4xf32>
    %cst_22 = arith.constant dense<0.000000e+00> : vector<32xf32>
    %32 = vector.multi_reduction <add>, %31, %cst_22 [1] : vector<32x4xf32> to vector<32xf32>
    %33 = vector.shape_cast %32 : vector<32xf32> to vector<32x1xf32>
    %34 = math.log %33 : vector<32x1xf32>
    %35 = vector.broadcast %34 : vector<32x1xf32> to vector<32x4xf32>
    %36 = arith.subf %30, %35 : vector<32x4xf32>
    %c0_23 = arith.constant 0 : index
    %c0_24 = arith.constant 0 : index
    %37 = vector.load %arg9[%c0_23, %c0_24] : memref<32x4xf32, #tpu.memory_space<vmem>>, vector<32x4xf32>
    tpu.vector_store %arg9[%c0_23, %c0_24], %36 {strides = array<i32>} : memref<32x4xf32, #tpu.memory_space<vmem>>, vector<32x4xf32>,
    return
  }
  func.func @transform_0(%arg0: i32) -> (i32, i32) {
    %c0_i32 = arith.constant 0 : i32
    %c0_i32_0 = arith.constant 0 : i32
    return %arg0, %c0_i32 : i32, i32
  }
  func.func @transform_1(%arg0: i32) -> (i32, i32) {
    %c0_i32 = arith.constant 0 : i32
    %c0_i32_0 = arith.constant 0 : i32
    %c0_i32_1 = arith.constant 0 : i32
    return %c0_i32, %c0_i32_0 : i32, i32
  }
  func.func @transform_2(%arg0: i32) -> (i32, i32) {
    %c0_i32 = arith.constant 0 : i32
    %c0_i32_0 = arith.constant 0 : i32
    %c0_i32_1 = arith.constant 0 : i32
    return %c0_i32, %c0_i32_0 : i32, i32
  }
  func.func @transform_3(%arg0: i32) -> (i32, i32) {
    %c0_i32 = arith.constant 0 : i32
    %c0_i32_0 = arith.constant 0 : i32
    %c0_i32_1 = arith.constant 0 : i32
    return %c0_i32, %c0_i32_0 : i32, i32
  }
  func.func @transform_4(%arg0: i32) -> (i32, i32) {
    %c0_i32 = arith.constant 0 : i32
    %c0_i32_0 = arith.constant 0 : i32
    %c0_i32_1 = arith.constant 0 : i32
    return %c0_i32, %c0_i32_0 : i32, i32
  }
  func.func @transform_5(%arg0: i32) -> (i32, i32) {
    %c0_i32 = arith.constant 0 : i32
    %c0_i32_0 = arith.constant 0 : i32
    %c0_i32_1 = arith.constant 0 : i32
    return %c0_i32, %c0_i32_0 : i32, i32
  }
  func.func @transform_6(%arg0: i32) -> (i32, i32) {
    %c0_i32 = arith.constant 0 : i32
    %c0_i32_0 = arith.constant 0 : i32
    %c0_i32_1 = arith.constant 0 : i32
    return %c0_i32, %c0_i32_0 : i32, i32
  }
  func.func @transform_7(%arg0: i32) -> (i32, i32) {
    %c0_i32 = arith.constant 0 : i32
    %c0_i32_0 = arith.constant 0 : i32
    %c0_i32_1 = arith.constant 0 : i32
    return %c0_i32, %c0_i32_0 : i32, i32
  }
  func.func @transform_8(%arg0: i32) -> (i32, i32) {
    %c0_i32 = arith.constant 0 : i32
    %c0_i32_0 = arith.constant 0 : i32
    return %arg0, %c0_i32 : i32, i32
  }
}

</mosaic_0001>

<bundles_post_ra>
// kernel: net_forward.5
= control target key start
LH: loop header
LB: loop body
LE: loop exit
PB: predicated region body
PF: predicated region fallthrough
CT: control target
= control target key end

     0   :  { %s940_s24 = smov 0   ;;  %s1024_s0 = inlined_call_operand.vmem [shape: f32[64,64], index: 0, kind: input, shape index: {}]   ;;  %s1025_s1 = inlined_call_operand.vmem [shape: f32[64,8], index: 1, kind: input, shape index: {}]   ;;  %s1026_s2 = inlined_call_operand.vmem [shape: f32[8,32], index: 2, kind: input, shape index: {}]   ;;  %s1027_s3 = inlined_call_operand.vmem [shape: f32[8,32], index: 3, kind: input, shape index: {}]   ;;  %s1028_s4 = inlined_call_operand.vmem [shape: f32[1,32], index: 4, kind: input, shape index: {}]   ;;  %s1029_s5 = inlined_call_operand.vmem [shape: f32[1,32], index: 5, kind: input, shape index: {}]   ;;  %s1030_s6 = inlined_call_operand.vmem [shape: f32[64,32], index: 6, kind: output, shape index: {0}]   ;;  %s1031_s7 = inlined_call_operand.vmem [shape: f32[64,1], index: 7, kind: output, shape index: {1}]  }
   0x1 LB: > { %s767_s25 = sadd.s32 4294967295, %s898_s24   ;;  %p771_p0 = scmp.ge.s32.totalorder %s898_s24, 1  ;;  %s898_s24 = sphi %s940_s24, %s18_s24  }
   0x2   : > { %p241_p1 = scmp.lt.s32.totalorder %s898_s24, 3 }
   0x4   : > { %p242_p2 = pnand %p771_p0, %p241_p1 }
   0x5   : > { %v296_v0 = vld [vmem:[%s1025_s1] sm:$0xff] (!%p242_p2)  ;;  %v297_v1 = vld [vmem:[%s1025_s1 + $0x8] sm:$0xff] (!%p242_p2)  ;;  %v298_v2 = vld [vmem:[%s1025_s1 + $0x10] sm:$0xff] (!%p242_p2)  ;;  %s772_s9 = sshll.u32 (!%p242_p2), %s767_s25, 2  ;;  %s778_s10 = sshll.u32 (!%p242_p2), %s767_s25, 5  ;;  %vm414_vm0 = vcmask (!%p242_p2), 64512   ;;  %v632_v29 = vlaneseq (!%p242_p2) }
   0x6   : > { %245 = sbr.rel (%p242_p2) target bundleno = 619 (0x26b), region = 44  ;;  %v854_v3 = vpack.c.bf16 (!%p242_p2), %v297_v1, %v296_v0  ;;  %v299_v4 = vld [vmem:[%s1025_s1 + $0x18] sm:$0xff] (!%p242_p2)  ;;  %p279_p3 = scmp.lt.s32.totalorder (!%p242_p2), %s772_s9, 7  ;;  %v300_v6 = vld [vmem:[%s1025_s1 + $0x20] sm:$0xff] (!%p242_p2)  ;;  %v301_v7 = vld [vmem:[%s1025_s1 + $0x28] sm:$0xff] (!%p242_p2)  ;;  %vm314_vm1 = vcmask (!%p242_p2), 523264  }
   0x7   : > { %s305_s15 = scalar_lea.vmem (!%p242_p2), %s1025_s1, %s778_s10  ;;  %v858_v5 = vpack.c.bf16 (!%p242_p2), %v299_v4, %v298_v2  ;;  %v413_v8 = vld [vmem:[%s1027_s3] sm:$0xff] (!%p242_p2)  ;;  %v862_v13 = vpack.c.bf16 (!%p242_p2), %v301_v7, %v300_v6  ;;  %v302_v14 = vld [vmem:[%s1025_s1 + $0x30] sm:$0xff] (!%p242_p2)  ;;  %v303_v15 = vld [vmem:[%s1025_s1 + $0x38] sm:$0xff] (!%p242_p2)  ;;  %vm626_vm2 = vcmask (!%p242_p2), 253952   ;;  %v633_v30 = vshrl.u32 (!%p242_p2), %v632_v29, 7 }
   0x8   : > { %855 = vmatprep.subr.bf16.mxu0 (!%p242_p2), %v854_v3  ;;  %838 = vmatprep.subr.mxu1 (!%p242_p2), %v413_v8  ;;  %v306_v9 = vld [vmem:[%s305_s15] sm:$0xff] (!%p242_p2)  ;;  %v307_v11 = vld [vmem:[%s305_s15 + $0x8] sm:$0xff] (!%p242_p2)  ;;  %v308_v12 = vld [vmem:[%s305_s15 + $0x10] sm:$0xff] (!%p242_p2)  ;;  %v866_v18 = vpack.c.bf16 (!%p242_p2), %v303_v15, %v302_v14  ;;  %vm641_vm3 = vcmask (!%p242_p2), 261120   ;;  %vm666_vm4 = vcmask (!%p242_p2), 7168  }
   0x9   : > { %v412_v10 = vld [vmem:[%s1026_s2] sm:$0xff] (!%p242_p2)  ;;  %857 = vmatpush3.bf16.msra.mxu0 (!%p242_p2), %v854_v3  ;;  %839 = vmatpush3.msra.mxu1 (!%p242_p2), %v413_v8  ;;  %v309_v17 = vld [vmem:[%s305_s15 + $0x18] sm:$0xff] (!%p242_p2)  ;;  %v634_v31 = vsub.s32 (!%p242_p2), 0, %v633_v30 }
   0xa   : > { %859 = vmatprep.subr.bf16.mxu0 (!%p242_p2), %v858_v5  ;;  %840 = vmatprep.mubr.msk.f32.mxu1 (!%p242_p2), %vm414_vm0, %v306_v9  ;;  %v624_v22 = vld [vmem:[%s1029_s5] sm:$0x1] (!%p242_p2) }
   0xb   : > { %846 = vmatprep.subr.mxu1 (!%p242_p2), %v412_v10  ;;  %841 = vmatmul.mubr.msk.f32.vlgmr.msra.gmra.mrb[0].mxu1 (!%p242_p2), %vm414_vm0, %v307_v11  ;;  %v625_v23 = vmul.f32 (!%p242_p2), %v624_v22, %v624_v22  ;;  %v791_v32 = vld [vmem:[%s1028_s4] ss:$0 sm:$0xff] (!%p242_p2)  ;;  %v635_v34 = vrot.slane (!%p242_p2), %v624_v22, %v634_v31 }
   0xc   : > { %847 = vmatpush3.msra.mxu1 (!%p242_p2), %v412_v10  ;;  %843 = vmatprep.mubr.msk.f32.mxu1 (!%p242_p2), %vm414_vm0, %v308_v12 }
   0xd   : > { %s1033_s9 = smov (!%p279_p3, %s772_s9), 7  ;;  %861 = vmatpush3.bf16.msra.mxu0 %v858_v5  ;;  %v627_v24 = vsel %vm626_vm2, %v625_v23, 0.0 }
   0xe   : > { %s975_s25 = sshll.u32 %s1033_s9, 3  ;;  %863 = vmatprep.subr.bf16.mxu0 %v862_v13  ;;  %628 = vadd.xlane.f32.xlu0 %v627_v24 }
   0xf   : > { %s282_s10 = scalar_lea.vmem %s1024_s0, %s975_s25  ;;  %844 = vmatmul.mubr.msk.f32.gmra.mrb[2].mxu1 %vm414_vm0, %v309_v17  ;;  %s288_s16 = scalar_lea.vmem %s1030_s6, %s975_s25 }
  0x10   : > { %v310_v16 = vld [vmem:[%s282_s10] sm:$0xff]  ;;  %v311_v19 = vld [vmem:[%s282_s10 + $0x8] sm:$0xff]  ;;  %v312_v20 = vld [vmem:[%s282_s10 + $0x10] sm:$0xff]  ;;  %s294_s19 = scalar_lea.vmem %s1031_s7, %s975_s25 }
  0x11   : > { %832 = vmatprep.mubr.msk.f32.mxu0 %vm314_vm1, %v310_v16  ;;  %865 = vmatpush3.bf16.msra.mxu0 %v862_v13  ;;  %v313_v21 = vld [vmem:[%s282_s10 + $0x18] sm:$0xff] }
  0x12   : > { %867 = vmatprep.subr.bf16.mxu0 %v866_v18 }
  0x15   : > { %869 = vmatpush3.bf16.msra.mxu0 %v866_v18 }
  0x18   : > { %833 = vmatmul.mubr.msk.f32.vlgmr.msra.gmra.mrb[0].mxu0 %vm314_vm1, %v311_v19 }
  0x19   : > { %835 = vmatprep.mubr.msk.f32.mxu0 %vm314_vm1, %v312_v20 }
  0x1c   : > { %836 = vmatmul.mubr.msk.f32.gmra.mrb[2].mxu0 %vm314_vm1, %v313_v21 }
  0x9b   : > { %v629_v54 = vpop.xlane.xlu0 %628 }
  0x9c   : > { %882 = vrsqrt.f32 %v629_v54 }
  0xa6   : > { %v883_v55 = vpop.eup %882 }
  0xa7   : > { %v657_v56 = vrot.slane %v883_v55, %v634_v31 }
  0xeb   : > { %v834_v25 = vpop.f32.mrb[0].mxu0 }
  0xec   : > { %v393_v26 = vpop.f32.mrb[1].mxu0 }
  0xed   : > { %848 = vmatprep.mubr.msk.f32.mxu1 %vm414_vm0, %v393_v26 }
  0xee   : > { %849 = vmatmul.mubr.msk.f32.vlgmr.msra.gmra.mrb[0].mxu1 %vm414_vm0, %v834_v25 }
  0xef   : > { %v837_v27 = vpop.f32.mrb[2].mxu0 }
  0xf0   : > { %v403_v28 = vpop.f32.mrb[3].mxu0 }
  0xf1   : > { %851 = vmatprep.mubr.msk.f32.mxu1 %vm414_vm0, %v403_v28 }
  0xf2   : > { %852 = vmatmul.mubr.msk.f32.gmra.mrb[2].mxu1 %vm414_vm0, %v837_v27 }
 0x1c1   : > { %v850_v33 = vpop.f32.mrb[0].mxu1 }
 0x1c2   : > { %v617_v35 = vadd.f32 %v850_v33, %v791_v32  ;;  %v590_v36 = vpop.f32.mrb[1].mxu1 }
 0x1c3   : > { %v616_v37 = vadd.f32 %v791_v32, %v590_v36 }
 0x1c4   : > { %v621_v38 = vmax.f32 %v617_v35, 0.0 }
 0x1c5   : > { %v620_v39 = vmax.f32 %v616_v37, 0.0  ;;  %v853_v40 = vpop.f32.mrb[2].mxu1 }
 0x1c6   : > { %v619_v41 = vadd.f32 %v853_v40, %v791_v32  ;;  %v600_v42 = vpop.f32.mrb[3].mxu1  ;;  %v638_v43 = vmul.f32 %v635_v34, %v621_v38  ;;  %672 = vst.msk [vmem:[%s288_s16 + $0x8] sm:$0xff] %vm641_vm3, %v621_v38 }
 0x1c7   : > { %671 = vst.msk [vmem:[%s288_s16] sm:$0xff] %vm641_vm3, %v620_v39  ;;  %v618_v44 = vadd.f32 %v791_v32, %v600_v42  ;;  %v637_v45 = vmul.f32 %v635_v34, %v620_v39 }
 0x1c8   : > { %v623_v46 = vmax.f32 %v619_v41, 0.0  ;;  %v645_v47 = vsel %vm641_vm3, %v638_v43, 0.0 }
 0x1c9   : > { %v622_v48 = vmax.f32 %v618_v44, 0.0  ;;  %646 = vadd.xlane.f32.xlu1 %v645_v47  ;;  %v642_v49 = vsel %vm641_vm3, %v637_v45, 0.0 }
 0x1ca   : > { %643 = vadd.xlane.f32.xlu0 %v642_v49  ;;  %v640_v50 = vmul.f32 %v635_v34, %v623_v46  ;;  %674 = vst.msk [vmem:[%s288_s16 + $0x18] sm:$0xff] %vm641_vm3, %v623_v46 }
 0x1cb   : > { %673 = vst.msk [vmem:[%s288_s16 + $0x10] sm:$0xff] %vm641_vm3, %v622_v48  ;;  %v639_v51 = vmul.f32 %v635_v34, %v622_v48 }
 0x1cc   : > { %v651_v52 = vsel %vm641_vm3, %v640_v50, 0.0 }
 0x1cd   : > { %v648_v53 = vsel %vm641_vm3, %v639_v51, 0.0 }
 0x1ce   : > { %652 = vadd.xlane.f32.xlu0 %v651_v52  ;;  %649 = vadd.xlane.f32.xlu1 %v648_v53 }
 0x256   : > { %v647_v57 = vpop.xlane.xlu1 %646 }
 0x257   : > { %v659_v58 = vmul.f32 %v657_v56, %v647_v57  ;;  %v644_v59 = vpop.xlane.xlu0 %643 }
 0x258   : > { %v658_v60 = vmul.f32 %v657_v56, %v644_v59 }
 0x25a   : > { %884 = vtanh.f32 %v658_v60 }
 0x25b   : > { %886 = vtanh.f32 %v659_v58  ;;  %v653_v61 = vpop.xlane.xlu0 %652  ;;  %v650_v62 = vpop.xlane.xlu1 %649 }
 0x25c   : > { %v661_v63 = vmul.f32 %v657_v56, %v653_v61  ;;  %v660_v0 = vmul.f32 %v657_v56, %v650_v62 }
 0x25e   : > { %888 = vtanh.f32 %v661_v63 }
 0x25f   : > { %890 = vtanh.f32 %v660_v0 }
 0x264   : > { %v885_v1 = vpop.eup %884 }
 0x265   : > { %v887_v2 = vpop.eup %886  ;;  %667 = vst.msk [vmem:[%s294_s19] sm:$0xff] %vm666_vm4, %v885_v1 }
 0x266   : > { %668 = vst.msk [vmem:[%s294_s19 + $0x8] sm:$0xff] %vm666_vm4, %v887_v2 }
 0x268   : > { %v889_v3 = vpop.eup %888 }
 0x269   : > { %v891_v4 = vpop.eup %890  ;;  %670 = vst.msk [vmem:[%s294_s19 + $0x18] sm:$0xff] %vm666_vm4, %v889_v3 }
 0x26a   : > { %669 = vst.msk [vmem:[%s294_s19 + $0x10] sm:$0xff] %vm666_vm4, %v891_v4 }
 0x26b PF: > { %s18_s24 = sadd.s32 1, %s898_s24  }
 0x26c   : > { %p15_p4 = scmp.ge.s32.totalorder %s18_s24, 4  }
 0x26e   :  { %17 = sbr.rel (!%p15_p4) target bundleno = 1 (0x1), region = 87 }

// kernel: net_forward.6
= control target key start
LH: loop header
LB: loop body
LE: loop exit
PB: predicated region body
PF: predicated region fallthrough
CT: control target
= control target key end

     0   :  { %v717_v0 = vmov 0.0|0.0   ;;  %vm718_vm0 = vmmov 0   ;;  %v719_v4 = vmov 0.0   ;;  %vm61_vm1 = vcmask 1043456   ;;  %s983_s1 = inlined_call_operand.vmem [shape: f32[52,32], index: 1, kind: input, shape index: {}]   ;;  %s984_s3 = inlined_call_operand.vmem [shape: f32[32,16], index: 3, kind: input, shape index: {}]   ;;  %s985_s2 = inlined_call_operand.vmem [shape: f32[32,16], index: 2, kind: input, shape index: {}]   ;;  %s986_s0 = inlined_call_operand.vmem [shape: f32[52,52], index: 0, kind: input, shape index: {}]   ;;  %s987_s5 = inlined_call_operand.vmem [shape: f32[1,16], index: 5, kind: input, shape index: {}]   ;;  %s988_s4 = inlined_call_operand.vmem [shape: f32[1,16], index: 4, kind: input, shape index: {}]   ;;  %s989_s6 = inlined_call_operand.vmem [shape: f32[52,16], index: 6, kind: output, shape index: {0}]   ;;  %s990_s7 = inlined_call_operand.vmem [shape: f32[52,1], index: 7, kind: output, shape index: {1}]  }
   0x1   :  { %673 = vmatprep.subr.bf16.mxu0 %v717_v0  ;;  %v763_v1 = vld [vmem:[%s983_s1] sm:$0xff]  ;;  %v768_v2 = vld [vmem:[%s983_s1 + $0x8] sm:$0xff]  ;;  %v27_v3 = vld [vmem:[%s983_s1 + $0x10] sm:$0xff]  ;;  %594 = vmatprep.mubr.msk.f32.mxu0 %vm718_vm0, %v719_v4  ;;  %vm173_vm2 = vcmask 261120   ;;  %vm39_vm3 = vcmask 424960   ;;  %vm438_vm4 = vcmask 122880   ;;  %v444_v62 = vlaneseq }
   0x2   :  { %v674_v5 = vpack.c.bf16 %v768_v2, %v763_v1  ;;  %v28_v6 = vld [vmem:[%s983_s1 + $0x18] sm:$0xff]  ;;  %694 = vmatprep.subr.bf16.mxu1 %v717_v0  ;;  %629 = vmatprep.mubr.msk.f32.mxu1 %vm718_vm0, %v719_v4  ;;  %v29_v8 = vld [vmem:[%s983_s1 + $0x20] sm:$0xff]  ;;  %v30_v9 = vld [vmem:[%s983_s1 + $0x28] sm:$0xff]  ;;  %vm456_vm5 = vcmask 130048   ;;  %vm475_vm6 = vcmask 125952   ;;  %vm497_vm7 = vcmask 7168  }
   0x3   :  { %v677_v7 = vpack.c.bf16 %v28_v6, %v27_v3  ;;  %v169_v10 = vld [vmem:[%s984_s3] sm:$0xff]  ;;  %v170_v11 = vld [vmem:[%s984_s3 + $0x8] sm:$0xff]  ;;  %v171_v12 = vld [vmem:[%s984_s3 + $0x10] sm:$0xff]  ;;  %v680_v15 = vpack.c.bf16 %v30_v9, %v29_v8  ;;  %v909_v63 = vshrl.u32 %v444_v62, 7  ;;  %vm504_vm8 = vcmask 3072  }
   0x4   :  { %675 = vmatpush3.bf16.msra.mxu0 %v674_v5  ;;  %v172_v13 = vld [vmem:[%s984_s3 + $0x18] sm:$0xff]  ;;  %v683_v14 = vpack.c.bf16 %v170_v11, %v169_v10  ;;  %v165_v17 = vld [vmem:[%s985_s2] sm:$0xff]  ;;  %v166_v18 = vld [vmem:[%s985_s2 + $0x8] sm:$0xff] }
   0x5   :  { %676 = vmatprep.subr.bf16.mxu0 %v717_v0  ;;  %v686_v16 = vpack.c.bf16 %v172_v13, %v171_v12  ;;  %v31_v19 = vld [vmem:[%s983_s1 + $0x30] sm:$0xf]  ;;  %v32_v20 = vld [vmem:[%s986_s0] sm:$0xff]  ;;  %v689_v21 = vpack.c.bf16 %v166_v18, %v165_v17  ;;  %v168_v23 = vld [vmem:[%s985_s2 + $0x18] sm:$0xff] }
   0x6   :  { %696 = vmatpush3.bf16.msra.mxu1 %v683_v14  ;;  %v167_v22 = vld [vmem:[%s985_s2 + $0x10] sm:$0xff]  ;;  %v33_v24 = vld [vmem:[%s986_s0 + $0x8] sm:$0xff]  ;;  %v35_v27 = vld [vmem:[%s986_s0 + $0x18] sm:$0xff] }
   0x7   :  { %695 = vmatprep.subr.bf16.mxu1 %v717_v0  ;;  %v692_v25 = vpack.c.bf16 %v168_v23, %v167_v22  ;;  %v34_v26 = vld [vmem:[%s986_s0 + $0x10] sm:$0xff]  ;;  %v36_v28 = vld [vmem:[%s986_s0 + $0x20] sm:$0xff]  ;;  %v37_v29 = vld [vmem:[%s986_s0 + $0x28] sm:$0xff] }
   0x8   :  { %678 = vmatpush3.bf16.msra.mxu0 %v677_v7  ;;  %v38_v30 = vld [vmem:[%s986_s0 + $0x30] sm:$0xf]  ;;  %v436_v31 = vld [vmem:[%s987_s5] sm:$0x1] }
   0x9   :  { %679 = vmatprep.subr.bf16.mxu0 %v717_v0  ;;  %v437_v32 = vmul.f32 %v436_v31, %v436_v31 }
   0xa   :  { %697 = vmatpush3.bf16.msra.mxu1 %v686_v16 }
   0xb   :  { %688 = vmatprep.subr.bf16.mxu1 %v717_v0  ;;  %v439_v33 = vsel %vm438_vm4, %v437_v32, 0.0 }
   0xc   :  { %681 = vmatpush3.bf16.msra.mxu0 %v680_v15  ;;  %440 = vadd.xlane.f32.xlu0 %v439_v33 }
   0xd   :  { %592 = vmatprep.subr.mxu0 %v719_v4  ;;  %630 = vmatmul.mubr.msk.f32.vlgmr.msra.gmra.mrb[0].mxu1 %vm173_vm2, %v27_v3 }
   0xe   :  { %690 = vmatpush3.bf16.msra.mxu1 %v689_v21  ;;  %632 = vmatprep.mubr.msk.f32.mxu1 %vm718_vm0, %v719_v4 }
   0xf   :  { %691 = vmatprep.subr.bf16.mxu1 %v717_v0 }
  0x10   :  { %593 = vmatpush3.msk.msra.mxu0 %vm61_vm1, %v31_v19 }
  0x11   :  { %595 = vmatmul.mubr.msk.f32.vlgmr.msra.gmra.mrb[0].mxu0 %vm39_vm3, %v32_v20  ;;  %682 = vmatprep.subr.bf16.mxu0 %v717_v0 }
  0x12   :  { %597 = vmatprep.mubr.msk.f32.mxu0 %vm718_vm0, %v719_v4  ;;  %684 = vmatpush3.bf16.msra.mxu0 %v683_v14 }
  0x13   :  { %633 = vmatmul.mubr.msk.f32.gmra.mrb[2].mxu1 %vm173_vm2, %v28_v6  ;;  %685 = vmatprep.subr.bf16.mxu0 %v717_v0  ;;  %v446_v0 = vsub.s32 0, %v909_v63 }
  0x14   :  { %635 = vmatprep.mubr.msk.f32.mxu1 %vm718_vm0, %v719_v4  ;;  %693 = vmatpush3.bf16.msra.mxu1 %v692_v25 }
  0x15   :  { %598 = vmatmul.mubr.msk.f32.gmra.mrb[2].mxu0 %vm39_vm3, %v33_v24  ;;  %v447_v5 = vrot.slane %v436_v31, %v446_v0 }
  0x16   :  { %600 = vmatprep.mubr.msk.f32.mxu0 %vm718_vm0, %v719_v4  ;;  %687 = vmatpush3.bf16.msra.mxu0 %v686_v16 }
  0x17   :  { %636 = vmatmul.mubr.msk.f32.gmra.mrb[4].mxu1 %vm173_vm2, %v29_v8 }
  0x18   :  { %638 = vmatprep.mubr.msk.f32.mxu1 %vm718_vm0, %v719_v4 }
  0x19   :  { %601 = vmatmul.mubr.msk.f32.gmra.mrb[4].mxu0 %vm39_vm3, %v34_v26 }
  0x1a   :  { %603 = vmatprep.mubr.msk.f32.mxu0 %vm718_vm0, %v719_v4 }
  0x1b   :  { %639 = vmatmul.mubr.msk.f32.gmra.mrb[6].mxu1 %vm173_vm2, %v30_v9 }
  0x1c   :  { %641 = vmatprep.mubr.msk.f32.mxu1 %vm718_vm0, %v719_v4 }
  0x1d   :  { %604 = vmatmul.mubr.msk.f32.gmra.mrb[6].mxu0 %vm39_vm3, %v35_v27 }
  0x1e   :  { %606 = vmatprep.mubr.msk.f32.mxu0 %vm718_vm0, %v719_v4 }
  0x1f   :  { %642 = vmatmul.mubr.msk.f32.gmra.mrb[8].mxu1 %vm173_vm2, %v31_v19 }
  0x20   :  { %652 = vmatprep.mubr.msk.f32.mxu1 %vm718_vm0, %v719_v4 }
  0x21   :  { %607 = vmatmul.mubr.msk.f32.gmra.mrb[8].mxu0 %vm39_vm3, %v36_v28 }
  0x22   :  { %609 = vmatprep.mubr.msk.f32.mxu0 %vm718_vm0, %v719_v4 }
  0x25   :  { %610 = vmatmul.mubr.msk.f32.gmra.mrb[10].mxu0 %vm39_vm3, %v37_v29 }
  0x26   :  { %612 = vmatprep.mubr.msk.f32.mxu0 %vm718_vm0, %v719_v4 }
  0x29   :  { %613 = vmatmul.mubr.msk.f32.gmra.mrb[12].mxu0 %vm39_vm3, %v38_v30 }
  0x2a   :  { %623 = vmatprep.mubr.msk.f32.mxu0 %vm718_vm0, %v719_v4 }
  0x2d   :  { %624 = vmatmul.mubr.msk.f32.vlgmr.msra.gmra.mrb[14].mxu0 %vm173_vm2, %v763_v1 }
  0x2e   :  { %626 = vmatprep.mubr.msk.f32.mxu0 %vm718_vm0, %v719_v4 }
  0x31   :  { %627 = vmatmul.mubr.msk.f32.gmra.mrb[16].mxu0 %vm173_vm2, %v768_v2  ;;  %v543_v2 = vld [vmem:[%s988_s4] ss:$0 sm:$0xff] }
  0xe0   :  { %v270_v34 = vpop.f32.mrb[0].mxu1 }
  0xe1   :  { %v631_v36 = vpop.f32.mrb[1].mxu1 }
  0xe4   :  { %v131_v35 = vpop.f32.mrb[0].mxu0 }
  0xe5   :  { %v596_v37 = vpop.f32.mrb[1].mxu0  ;;  %653 = vmatmul.mubr.msk.f32.vlgmr.msra.gmra.mrb[10].mxu1 %vm173_vm2, %v131_v35 }
  0xe6   :  { %655 = vmatprep.mubr.msk.f32.mxu1 %vm718_vm0, %v719_v4  ;;  %v885_v38 = vpop.f32.mrb[2].mxu1 }
  0xe7   :  { %v634_v40 = vpop.f32.mrb[3].mxu1 }
  0xe8   :  { %v136_v39 = vpop.f32.mrb[2].mxu0 }
  0xe9   :  { %v599_v41 = vpop.f32.mrb[3].mxu0  ;;  %656 = vmatmul.mubr.msk.f32.gmra.mrb[12].mxu1 %vm173_vm2, %v136_v39 }
  0xea   :  { %658 = vmatprep.mubr.msk.f32.mxu1 %vm718_vm0, %v719_v4  ;;  %v890_v42 = vpop.f32.mrb[4].mxu1 }
  0xeb   :  { %v637_v44 = vpop.f32.mrb[5].mxu1 }
  0xec   :  { %v141_v43 = vpop.f32.mrb[4].mxu0 }
  0xed   :  { %v602_v45 = vpop.f32.mrb[5].mxu0  ;;  %659 = vmatmul.mubr.msk.f32.gmra.mrb[14].mxu1 %vm173_vm2, %v141_v43 }
  0xee   :  { %661 = vmatprep.mubr.msk.f32.mxu1 %vm718_vm0, %v719_v4  ;;  %v895_v46 = vpop.f32.mrb[6].mxu1 }
  0xef   :  { %v640_v48 = vpop.f32.mrb[7].mxu1 }
  0xf0   :  { %v146_v47 = vpop.f32.mrb[6].mxu0 }
  0xf1   :  { %v605_v49 = vpop.f32.mrb[7].mxu0  ;;  %662 = vmatmul.mubr.msk.f32.gmra.mrb[16].mxu1 %vm173_vm2, %v146_v47 }
  0xf2   :  { %664 = vmatprep.mubr.msk.f32.mxu1 %vm718_vm0, %v719_v4  ;;  %v900_v50 = vpop.f32.mrb[8].mxu1 }
  0xf3   :  { %v643_v52 = vpop.f32.mrb[9].mxu1 }
  0xf4   :  { %v151_v51 = vpop.f32.mrb[8].mxu0  ;;  %v441_v52 = vpop.xlane.xlu0 %440 }
  0xf5   :  { %v608_v53 = vpop.f32.mrb[9].mxu0  ;;  %665 = vmatmul.mubr.msk.f32.gmra.mrb[18].mxu1 %vm173_vm2, %v151_v51  ;;  %701 = vrsqrt.f32 %v441_v52 }
  0xf6   :  { %667 = vmatprep.mubr.msk.f32.mxu1 %vm718_vm0, %v719_v4 }
  0xf8   :  { %v156_v54 = vpop.f32.mrb[10].mxu0 }
  0xf9   :  { %v611_v55 = vpop.f32.mrb[11].mxu0  ;;  %668 = vmatmul.mubr.msk.f32.gmra.mrb[20].mxu1 %vm173_vm2, %v156_v54 }
  0xfa   :  { %670 = vmatprep.mubr.msk.f32.mxu1 %vm718_vm0, %v719_v4 }
  0xfc   :  { %v161_v56 = vpop.f32.mrb[12].mxu0 }
  0xfd   :  { %v614_v57 = vpop.f32.mrb[13].mxu0  ;;  %671 = vmatmul.mubr.msk.f32.gmra.mrb[22].mxu1 %vm173_vm2, %v161_v56 }
  0xff   :  { %v702_v53 = vpop.eup %701 }
 0x100   :  { %v260_v58 = vpop.f32.mrb[14].mxu0  ;;  %v482_v54 = vrot.slane %v702_v53, %v446_v0 }
 0x101   :  { %v625_v59 = vpop.f32.mrb[15].mxu0 }
 0x104   :  { %v265_v60 = vpop.f32.mrb[16].mxu0 }
 0x105   :  { %v628_v61 = vpop.f32.mrb[17].mxu0 }
 0x1b8   :  { %v381_v1 = vpop.f32.mrb[10].mxu1 }
 0x1b9   :  { %v382_v3 = vadd.f32 %v381_v1, %v260_v58  ;;  %v654_v4 = vpop.f32.mrb[11].mxu1 }
 0x1bb   :  { %v422_v6 = vadd.f32 %v543_v2, %v382_v3 }
 0x1bc   :  { %v386_v7 = vpop.f32.mrb[12].mxu1 }
 0x1bd   :  { %v429_v8 = vmax.f32 %v422_v6, 0.0  ;;  %v387_v9 = vadd.f32 %v386_v7, %v265_v60  ;;  %v657_v10 = vpop.f32.mrb[13].mxu1 }
 0x1bf   :  { %506 = vst.msk [vmem:[%s989_s6] sm:$0xff] %vm456_vm5, %v429_v8  ;;  %v423_v11 = vadd.f32 %v543_v2, %v387_v9  ;;  %v449_v12 = vmul.f32 %v447_v5, %v429_v8 }
 0x1c0   :  { %v391_v13 = vpop.f32.mrb[14].mxu1 }
 0x1c1   :  { %v430_v14 = vmax.f32 %v423_v11, 0.0  ;;  %v392_v15 = vadd.f32 %v391_v13, %v270_v34  ;;  %v660_v16 = vpop.f32.mrb[15].mxu1  ;;  %v457_v17 = vsel %vm456_vm5, %v449_v12, 0.0 }
 0x1c2   :  { %458 = vadd.xlane.f32.xlu0 %v457_v17 }
 0x1c3   :  { %507 = vst.msk [vmem:[%s989_s6 + $0x8] sm:$0xff] %vm456_vm5, %v430_v14  ;;  %v424_v18 = vadd.f32 %v543_v2, %v392_v15  ;;  %v450_v19 = vmul.f32 %v447_v5, %v430_v14 }
 0x1c4   :  { %v396_v20 = vpop.f32.mrb[16].mxu1 }
 0x1c5   :  { %v431_v21 = vmax.f32 %v424_v18, 0.0  ;;  %v397_v22 = vadd.f32 %v396_v20, %v885_v38  ;;  %v663_v23 = vpop.f32.mrb[17].mxu1  ;;  %v460_v24 = vsel %vm456_vm5, %v450_v19, 0.0 }
 0x1c6   :  { %461 = vadd.xlane.f32.xlu1 %v460_v24 }
 0x1c7   :  { %508 = vst.msk [vmem:[%s989_s6 + $0x10] sm:$0xff] %vm456_vm5, %v431_v21  ;;  %v425_v25 = vadd.f32 %v543_v2, %v397_v22  ;;  %v451_v26 = vmul.f32 %v447_v5, %v431_v21 }
 0x1c8   :  { %v401_v27 = vpop.f32.mrb[18].mxu1 }
 0x1c9   :  { %v432_v28 = vmax.f32 %v425_v25, 0.0  ;;  %v402_v29 = vadd.f32 %v401_v27, %v890_v42  ;;  %v666_v30 = vpop.f32.mrb[19].mxu1  ;;  %v463_v31 = vsel %vm456_vm5, %v451_v26, 0.0 }
 0x1ca   :  { %464 = vadd.xlane.f32.xlu1 %v463_v31 }
 0x1cb   :  { %509 = vst.msk [vmem:[%s989_s6 + $0x18] sm:$0xff] %vm456_vm5, %v432_v28  ;;  %v426_v32 = vadd.f32 %v543_v2, %v402_v29  ;;  %v452_v33 = vmul.f32 %v447_v5, %v432_v28 }
 0x1cc   :  { %v406_v34 = vpop.f32.mrb[20].mxu1 }
 0x1cd   :  { %v433_v35 = vmax.f32 %v426_v32, 0.0  ;;  %v407_v36 = vadd.f32 %v406_v34, %v895_v46  ;;  %v669_v37 = vpop.f32.mrb[21].mxu1  ;;  %v466_v38 = vsel %vm456_vm5, %v452_v33, 0.0 }
 0x1ce   :  { %467 = vadd.xlane.f32.xlu0 %v466_v38 }
 0x1cf   :  { %510 = vst.msk [vmem:[%s989_s6 + $0x20] sm:$0xff] %vm456_vm5, %v433_v35  ;;  %v427_v39 = vadd.f32 %v543_v2, %v407_v36  ;;  %v453_v40 = vmul.f32 %v447_v5, %v433_v35 }
 0x1d0   :  { %v411_v41 = vpop.f32.mrb[22].mxu1 }
 0x1d1   :  { %v434_v42 = vmax.f32 %v427_v39, 0.0  ;;  %v412_v43 = vadd.f32 %v411_v41, %v900_v50  ;;  %v672_v44 = vpop.f32.mrb[23].mxu1  ;;  %v469_v45 = vsel %vm456_vm5, %v453_v40, 0.0 }
 0x1d2   :  { %470 = vadd.xlane.f32.xlu1 %v469_v45 }
 0x1d3   :  { %511 = vst.msk [vmem:[%s989_s6 + $0x28] sm:$0xff] %vm456_vm5, %v434_v42  ;;  %v428_v46 = vadd.f32 %v543_v2, %v412_v43  ;;  %v454_v47 = vmul.f32 %v447_v5, %v434_v42 }
 0x1d5   :  { %v435_v48 = vmax.f32 %v428_v46, 0.0  ;;  %v472_v49 = vsel %vm456_vm5, %v454_v47, 0.0 }
 0x1d6   :  { %473 = vadd.xlane.f32.xlu0 %v472_v49 }
 0x1d7   :  { %v455_v51 = vmul.f32 %v447_v5, %v435_v48  ;;  %512 = vst.msk [vmem:[%s989_s6 + $0x30] sm:$0xf] %vm475_vm6, %v435_v48 }
 0x1d9   :  { %v476_v50 = vsel %vm475_vm6, %v455_v51, 0.0 }
 0x1da   :  { %477 = vadd.xlane.f32.xlu1 %v476_v50 }
 0x24f   :  { %v459_v55 = vpop.xlane.xlu0 %458 }
 0x250   :  { %v483_v56 = vmul.f32 %v482_v54, %v459_v55 }
 0x252   :  { %703 = vtanh.f32 %v483_v56 }
 0x253   :  { %v462_v57 = vpop.xlane.xlu1 %461 }
 0x254   :  { %v484_v58 = vmul.f32 %v482_v54, %v462_v57 }
 0x256   :  { %705 = vtanh.f32 %v484_v58 }
 0x257   :  { %v465_v59 = vpop.xlane.xlu1 %464 }
 0x258   :  { %v485_v60 = vmul.f32 %v482_v54, %v465_v59 }
 0x25a   :  { %707 = vtanh.f32 %v485_v60 }
 0x25b   :  { %v468_v61 = vpop.xlane.xlu0 %467 }
 0x25c   :  { %v704_v62 = vpop.eup %703  ;;  %v486_v1 = vmul.f32 %v482_v54, %v468_v61 }
 0x25d   :  { %498 = vst.msk [vmem:[%s990_s7] sm:$0xff] %vm497_vm7, %v704_v62 }
 0x25e   :  { %709 = vtanh.f32 %v486_v1 }
 0x25f   :  { %v471_v63 = vpop.xlane.xlu1 %470 }
 0x260   :  { %v706_v0 = vpop.eup %705  ;;  %v487_v2 = vmul.f32 %v482_v54, %v471_v63 }
 0x261   :  { %499 = vst.msk [vmem:[%s990_s7 + $0x8] sm:$0xff] %vm497_vm7, %v706_v0 }
 0x262   :  { %711 = vtanh.f32 %v487_v2 }
 0x263   :  { %v474_v3 = vpop.xlane.xlu0 %473 }
 0x264   :  { %v708_v4 = vpop.eup %707  ;;  %v488_v5 = vmul.f32 %v482_v54, %v474_v3 }
 0x265   :  { %500 = vst.msk [vmem:[%s990_s7 + $0x10] sm:$0xff] %vm497_vm7, %v708_v4 }
 0x266   :  { %713 = vtanh.f32 %v488_v5 }
 0x267   :  { %v478_v6 = vpop.xlane.xlu1 %477 }
 0x268   :  { %v710_v7 = vpop.eup %709  ;;  %v489_v8 = vmul.f32 %v482_v54, %v478_v6 }
 0x269   :  { %501 = vst.msk [vmem:[%s990_s7 + $0x18] sm:$0xff] %vm497_vm7, %v710_v7 }
 0x26a   :  { %715 = vtanh.f32 %v489_v8 }
 0x26c   :  { %v712_v9 = vpop.eup %711 }
 0x26d   :  { %502 = vst.msk [vmem:[%s990_s7 + $0x20] sm:$0xff] %vm497_vm7, %v712_v9 }
 0x270   :  { %v714_v10 = vpop.eup %713 }
 0x271   :  { %503 = vst.msk [vmem:[%s990_s7 + $0x28] sm:$0xff] %vm497_vm7, %v714_v10 }
 0x274   :  { %v716_v11 = vpop.eup %715 }
 0x275   :  { %505 = vst.msk [vmem:[%s990_s7 + $0x30] sm:$0xf] %vm504_vm8, %v716_v11 }

// kernel: net_forward.7
= control target key start
LH: loop header
LB: loop body
LE: loop exit
PB: predicated region body
PF: predicated region fallthrough
CT: control target
= control target key end

     0   :  { %vm154_vm0 = vcmask 130048   ;;  %vm32_vm1 = vcmask 343040   ;;  %vm51_vm2 = vcmask 1041408   ;;  %vm534_vm3 = vmmov 1   ;;  %s657_s1 = inlined_call_operand.vmem [shape: f32[42,16], index: 1, kind: input, shape index: {}]   ;;  %s658_s0 = inlined_call_operand.vmem [shape: f32[42,42], index: 0, kind: input, shape index: {}]   ;;  %s659_s3 = inlined_call_operand.vmem [shape: f32[16,16], index: 3, kind: input, shape index: {}]   ;;  %s660_s2 = inlined_call_operand.vmem [shape: f32[16,16], index: 2, kind: input, shape index: {}]   ;;  %s661_s4 = inlined_call_operand.vmem [shape: f32[1,16], index: 4, kind: input, shape index: {}]   ;;  %s662_s5 = inlined_call_operand.vmem [shape: f32[42,16], index: 5, kind: output, shape index: {}]  }
   0x1   :  { %v20_v0 = vld [vmem:[%s657_s1] sm:$0xff]  ;;  %v21_v1 = vld [vmem:[%s657_s1 + $0x8] sm:$0xff]  ;;  %v22_v2 = vld [vmem:[%s657_s1 + $0x10] sm:$0xff]  ;;  %vm404_vm5 = vcmask 123904  }
   0x2   :  { %v505_v3 = vpack.c.bf16 %v21_v1, %v20_v0  ;;  %v23_v4 = vld [vmem:[%s657_s1 + $0x18] sm:$0xff]  ;;  %483 = vmatprep.mubr.msk.f32.mxu1 %vm154_vm0, %v20_v0  ;;  %v24_v6 = vld [vmem:[%s657_s1 + $0x20] sm:$0xff]  ;;  %v25_v7 = vld [vmem:[%s657_s1 + $0x28] sm:$0x3] }
   0x3   :  { %v509_v5 = vpack.c.bf16 %v23_v4, %v22_v2  ;;  %v26_v8 = vld [vmem:[%s658_s0] sm:$0xff]  ;;  %v153_v10 = vld [vmem:[%s659_s3 + $0x8] sm:$0xff]  ;;  %v513_v11 = vpack.c.bf16 %v25_v7, %v24_v6  ;;  %vm514_vm4 = vmpackc.low %vm51_vm2, %vm534_vm3 }
   0x4   :  { %506 = vmatprep.subr.bf16.mxu0 %v505_v3  ;;  %470 = vmatprep.mubr.msk.f32.mxu0 %vm32_vm1, %v26_v8  ;;  %v152_v9 = vld [vmem:[%s659_s3] sm:$0xff]  ;;  %v151_v14 = vld [vmem:[%s660_s2 + $0x8] sm:$0xff]  ;;  %v28_v17 = vld [vmem:[%s658_s0 + $0x10] sm:$0xff] }
   0x5   :  { %508 = vmatpush3.bf16.msra.mxu0 %v505_v3  ;;  %v519_v12 = vpack.c.bf16 %v153_v10, %v152_v9  ;;  %v150_v13 = vld [vmem:[%s660_s2] sm:$0xff]  ;;  %v27_v16 = vld [vmem:[%s658_s0 + $0x8] sm:$0xff]  ;;  %v29_v18 = vld [vmem:[%s658_s0 + $0x18] sm:$0xff] }
   0x6   :  { %510 = vmatprep.subr.bf16.mxu0 %v509_v5  ;;  %v523_v15 = vpack.c.bf16 %v151_v14, %v150_v13  ;;  %v30_v19 = vld [vmem:[%s658_s0 + $0x20] sm:$0xff]  ;;  %v31_v20 = vld [vmem:[%s658_s0 + $0x28] sm:$0x3] }
   0x7   :  { %520 = vmatprep.subr.bf16.mxu1 %v519_v12  ;;  %v429_v27 = vld [vmem:[%s661_s4] ss:$0 sm:$0xff] }
   0x8   :  { %522 = vmatpush3.bf16.msra.mxu1 %v519_v12 }
   0x9   :  { %512 = vmatpush3.bf16.msra.mxu0 %v509_v5  ;;  %524 = vmatprep.subr.bf16.mxu1 %v523_v15 }
   0xa   :  { %515 = vmatprep.subr.msk.bf16.mxu0 %vm514_vm4, %v513_v11 }
   0xb   :  { %484 = vmatmul.mubr.msk.f32.vlgmr.msra.gmra.mrb[0].mxu1 %vm154_vm0, %v21_v1 }
   0xc   :  { %526 = vmatpush3.bf16.msra.mxu1 %v523_v15  ;;  %486 = vmatprep.mubr.msk.f32.mxu1 %vm154_vm0, %v22_v2 }
   0xd   :  { %518 = vmatpush3.bf16.msk.msra.mxu0 %vm514_vm4, %v513_v11 }
   0xf   :  { %487 = vmatmul.mubr.msk.f32.gmra.mrb[2].mxu1 %vm154_vm0, %v23_v4 }
  0x10   :  { %471 = vmatmul.mubr.msk.f32.vlgmr.msra.gmra.mrb[0].mxu0 %vm32_vm1, %v27_v16  ;;  %489 = vmatprep.mubr.msk.f32.mxu1 %vm154_vm0, %v24_v6 }
  0x11   :  { %473 = vmatprep.mubr.msk.f32.mxu0 %vm32_vm1, %v28_v17 }
  0x13   :  { %490 = vmatmul.mubr.msk.f32.gmra.mrb[4].mxu1 %vm154_vm0, %v25_v7 }
  0x14   :  { %474 = vmatmul.mubr.msk.f32.gmra.mrb[2].mxu0 %vm32_vm1, %v29_v18 }
  0x15   :  { %476 = vmatprep.mubr.msk.f32.mxu0 %vm32_vm1, %v30_v19 }
  0x18   :  { %477 = vmatmul.mubr.msk.f32.gmra.mrb[4].mxu0 %vm32_vm1, %v31_v20 }
  0xe3   :  { %v472_v21 = vpop.f32.mrb[0].mxu0 }
  0xe4   :  { %v121_v22 = vpop.f32.mrb[1].mxu0 }
  0xe5   :  { %496 = vmatprep.mubr.msk.f32.mxu1 %vm154_vm0, %v121_v22 }
  0xe6   :  { %497 = vmatmul.mubr.msk.f32.vlgmr.msra.gmra.mrb[0].mxu1 %vm154_vm0, %v472_v21 }
  0xe7   :  { %v475_v23 = vpop.f32.mrb[2].mxu0 }
  0xe8   :  { %v131_v24 = vpop.f32.mrb[3].mxu0 }
  0xe9   :  { %499 = vmatprep.mubr.msk.f32.mxu1 %vm154_vm0, %v131_v24 }
  0xea   :  { %500 = vmatmul.mubr.msk.f32.gmra.mrb[2].mxu1 %vm154_vm0, %v475_v23 }
  0xeb   :  { %v478_v25 = vpop.f32.mrb[4].mxu0 }
  0xec   :  { %v141_v26 = vpop.f32.mrb[5].mxu0 }
  0xed   :  { %502 = vmatprep.mubr.msk.f32.mxu1 %vm154_vm0, %v141_v26 }
  0xee   :  { %503 = vmatmul.mubr.msk.f32.gmra.mrb[4].mxu1 %vm154_vm0, %v478_v25 }
 0x1b9   :  { %v498_v28 = vpop.f32.mrb[0].mxu1 }
 0x1ba   :  { %v388_v29 = vadd.f32 %v498_v28, %v429_v27  ;;  %v351_v30 = vpop.f32.mrb[1].mxu1 }
 0x1bb   :  { %v387_v31 = vadd.f32 %v429_v27, %v351_v30 }
 0x1bc   :  { %v394_v32 = vmax.f32 %v388_v29, 0.0 }
 0x1bd   :  { %v393_v33 = vmax.f32 %v387_v31, 0.0  ;;  %v501_v34 = vpop.f32.mrb[2].mxu1 }
 0x1be   :  { %400 = vst.msk [vmem:[%s662_s5 + $0x8] sm:$0xff] %vm154_vm0, %v394_v32  ;;  %v390_v35 = vadd.f32 %v501_v34, %v429_v27  ;;  %v361_v36 = vpop.f32.mrb[3].mxu1 }
 0x1bf   :  { %399 = vst.msk [vmem:[%s662_s5] sm:$0xff] %vm154_vm0, %v393_v33  ;;  %v389_v37 = vadd.f32 %v429_v27, %v361_v36 }
 0x1c0   :  { %v396_v38 = vmax.f32 %v390_v35, 0.0 }
 0x1c1   :  { %v395_v39 = vmax.f32 %v389_v37, 0.0  ;;  %v504_v40 = vpop.f32.mrb[4].mxu1 }
 0x1c2   :  { %402 = vst.msk [vmem:[%s662_s5 + $0x18] sm:$0xff] %vm154_vm0, %v396_v38  ;;  %v392_v41 = vadd.f32 %v504_v40, %v429_v27  ;;  %v371_v42 = vpop.f32.mrb[5].mxu1 }
 0x1c3   :  { %401 = vst.msk [vmem:[%s662_s5 + $0x10] sm:$0xff] %vm154_vm0, %v395_v39  ;;  %v391_v43 = vadd.f32 %v429_v27, %v371_v42 }
 0x1c4   :  { %v398_v44 = vmax.f32 %v392_v41, 0.0 }
 0x1c5   :  { %v397_v45 = vmax.f32 %v391_v43, 0.0 }
 0x1c6   :  { %405 = vst.msk [vmem:[%s662_s5 + $0x28] sm:$0x3] %vm404_vm5, %v398_v44 }
 0x1c7   :  { %403 = vst.msk [vmem:[%s662_s5 + $0x20] sm:$0xff] %vm154_vm0, %v397_v45 }

// kernel: net_forward.8
= control target key start
LH: loop header
LB: loop body
LE: loop exit
PB: predicated region body
PF: predicated region fallthrough
CT: control target
= control target key end

     0   :  { %v617_v0 = vmov 0.0|0.0   ;;  %vm618_vm0 = vmmov 0   ;;  %v619_v4 = vmov 0.0   ;;  %vm181_vm1 = vcmask 130048   ;;  %s832_s1 = inlined_call_operand.vmem [shape: f32[52,16], index: 1, kind: input, shape index: {}]   ;;  %s833_s2 = inlined_call_operand.vmem [shape: f32[52,16], index: 2, kind: input, shape index: {}]   ;;  %s834_s4 = inlined_call_operand.vmem [shape: f32[16,32], index: 4, kind: input, shape index: {}]   ;;  %s835_s3 = inlined_call_operand.vmem [shape: f32[16,32], index: 3, kind: input, shape index: {}]   ;;  %s836_s0 = inlined_call_operand.vmem [shape: f32[52,52], index: 0, kind: input, shape index: {}]   ;;  %s837_s5 = inlined_call_operand.vmem [shape: f32[1,32], index: 5, kind: input, shape index: {}]   ;;  %s838_s6 = inlined_call_operand.vmem [shape: f32[52,32], index: 6, kind: output, shape index: {}]  }
   0x1   :  { %597 = vmatprep.subr.bf16.mxu0 %v617_v0  ;;  %v23_v1 = vld [vmem:[%s832_s1] sm:$0xff]  ;;  %v24_v2 = vld [vmem:[%s832_s1 + $0x8] sm:$0xff]  ;;  %526 = vmatprep.mubr.msk.f32.mxu0 %vm618_vm0, %v619_v4  ;;  %v25_v7 = vld [vmem:[%s832_s1 + $0x10] sm:$0xff]  ;;  %vm73_vm2 = vcmask 1043456   ;;  %vm51_vm3 = vcmask 424960   ;;  %vm444_vm4 = vcmask 261120  }
   0x2   :  { %v30_v3 = vld [vmem:[%s833_s2] sm:$0xff]  ;;  %v31_v5 = vld [vmem:[%s833_s2 + $0x8] sm:$0xff]  ;;  %v26_v8 = vld [vmem:[%s832_s1 + $0x18] sm:$0xff]  ;;  %612 = vmatprep.subr.bf16.mxu1 %v617_v0  ;;  %557 = vmatprep.mubr.msk.f32.mxu1 %vm618_vm0, %v619_v4  ;;  %vm451_vm5 = vcmask 257024  }
   0x3   :  { %v669_v6 = vadd.f32 %v30_v3, %v23_v1  ;;  %v679_v9 = vadd.f32 %v31_v5, %v24_v2  ;;  %v32_v10 = vld [vmem:[%s833_s2 + $0x10] sm:$0xff]  ;;  %v33_v11 = vld [vmem:[%s833_s2 + $0x18] sm:$0xff]  ;;  %v27_v12 = vld [vmem:[%s832_s1 + $0x20] sm:$0xff] }
   0x4   :  { %v39_v13 = vadd.f32 %v32_v10, %v25_v7  ;;  %v40_v14 = vadd.f32 %v33_v11, %v26_v8  ;;  %v28_v15 = vld [vmem:[%s832_s1 + $0x28] sm:$0xff]  ;;  %v34_v16 = vld [vmem:[%s833_s2 + $0x20] sm:$0xff]  ;;  %v29_v29 = vld [vmem:[%s832_s1 + $0x30] sm:$0xf] }
   0x5   :  { %v35_v17 = vld [vmem:[%s833_s2 + $0x28] sm:$0xff]  ;;  %v598_v18 = vpack.c.bf16 %v679_v9, %v669_v6  ;;  %v41_v20 = vadd.f32 %v34_v16, %v27_v12  ;;  %v179_v22 = vld [vmem:[%s834_s4] sm:$0xff]  ;;  %v36_v30 = vld [vmem:[%s833_s2 + $0x30] sm:$0xf] }
   0x6   :  { %v601_v19 = vpack.c.bf16 %v40_v14, %v39_v13  ;;  %v42_v21 = vadd.f32 %v35_v17, %v28_v15  ;;  %v180_v23 = vld [vmem:[%s834_s4 + $0x8] sm:$0xff]  ;;  %v177_v24 = vld [vmem:[%s835_s3] sm:$0xff]  ;;  %v43_v31 = vadd.f32 %v36_v30, %v29_v29  ;;  %v46_v34 = vld [vmem:[%s836_s0 + $0x10] sm:$0xff] }
   0x7   :  { %599 = vmatpush3.bf16.msra.mxu0 %v598_v18  ;;  %v607_v25 = vpack.c.bf16 %v180_v23, %v179_v22  ;;  %v178_v26 = vld [vmem:[%s835_s3 + $0x8] sm:$0xff]  ;;  %v44_v32 = vld [vmem:[%s836_s0] sm:$0xff]  ;;  %v47_v35 = vld [vmem:[%s836_s0 + $0x18] sm:$0xff] }
   0x8   :  { %600 = vmatprep.subr.bf16.mxu0 %v617_v0  ;;  %v604_v27 = vpack.c.bf16 %v42_v21, %v41_v20  ;;  %v610_v28 = vpack.c.bf16 %v178_v26, %v177_v24  ;;  %v45_v33 = vld [vmem:[%s836_s0 + $0x8] sm:$0xff]  ;;  %v48_v36 = vld [vmem:[%s836_s0 + $0x20] sm:$0xff]  ;;  %v50_v38 = vld [vmem:[%s836_s0 + $0x30] sm:$0xf] }
   0x9   :  { %613 = vmatpush3.bf16.msra.mxu1 %v607_v25  ;;  %v49_v37 = vld [vmem:[%s836_s0 + $0x28] sm:$0xff]  ;;  %v479_v5 = vld [vmem:[%s837_s5] ss:$0 sm:$0xff] }
   0xa   :  { %609 = vmatprep.subr.bf16.mxu1 %v617_v0 }
   0xb   :  { %602 = vmatpush3.bf16.msra.mxu0 %v601_v19 }
   0xc   :  { %603 = vmatprep.subr.bf16.mxu0 %v617_v0  ;;  %558 = vmatmul.mubr.msk.f32.vlgmr.msra.gmra.mrb[0].mxu1 %vm181_vm1, %v39_v13 }
   0xd   :  { %611 = vmatpush3.bf16.msra.mxu1 %v610_v28  ;;  %560 = vmatprep.mubr.msk.f32.mxu1 %vm618_vm0, %v619_v4 }
   0xf   :  { %605 = vmatpush3.bf16.msra.mxu0 %v604_v27 }
  0x10   :  { %524 = vmatprep.subr.mxu0 %v619_v4  ;;  %561 = vmatmul.mubr.msk.f32.gmra.mrb[2].mxu1 %vm181_vm1, %v40_v14 }
  0x11   :  { %563 = vmatprep.mubr.msk.f32.mxu1 %vm618_vm0, %v619_v4 }
  0x13   :  { %525 = vmatpush3.msk.msra.mxu0 %vm73_vm2, %v43_v31 }
  0x14   :  { %527 = vmatmul.mubr.msk.f32.vlgmr.msra.gmra.mrb[0].mxu0 %vm51_vm3, %v44_v32  ;;  %606 = vmatprep.subr.bf16.mxu0 %v617_v0 }
  0x15   :  { %529 = vmatprep.mubr.msk.f32.mxu0 %vm618_vm0, %v619_v4  ;;  %608 = vmatpush3.bf16.msra.mxu0 %v607_v25 }
  0x16   :  { %564 = vmatmul.mubr.msk.f32.gmra.mrb[4].mxu1 %vm181_vm1, %v41_v20 }
  0x17   :  { %566 = vmatprep.mubr.msk.f32.mxu1 %vm618_vm0, %v619_v4 }
  0x18   :  { %530 = vmatmul.mubr.msk.f32.gmra.mrb[2].mxu0 %vm51_vm3, %v45_v33 }
  0x19   :  { %532 = vmatprep.mubr.msk.f32.mxu0 %vm618_vm0, %v619_v4 }
  0x1a   :  { %567 = vmatmul.mubr.msk.f32.gmra.mrb[6].mxu1 %vm181_vm1, %v42_v21 }
  0x1b   :  { %569 = vmatprep.mubr.msk.f32.mxu1 %vm618_vm0, %v619_v4 }
  0x1c   :  { %533 = vmatmul.mubr.msk.f32.gmra.mrb[4].mxu0 %vm51_vm3, %v46_v34 }
  0x1d   :  { %535 = vmatprep.mubr.msk.f32.mxu0 %vm618_vm0, %v619_v4 }
  0x1e   :  { %570 = vmatmul.mubr.msk.f32.gmra.mrb[8].mxu1 %vm181_vm1, %v43_v31 }
  0x1f   :  { %576 = vmatprep.mubr.msk.f32.mxu1 %vm618_vm0, %v619_v4 }
  0x20   :  { %536 = vmatmul.mubr.msk.f32.gmra.mrb[6].mxu0 %vm51_vm3, %v47_v35 }
  0x21   :  { %538 = vmatprep.mubr.msk.f32.mxu0 %vm618_vm0, %v619_v4 }
  0x24   :  { %539 = vmatmul.mubr.msk.f32.gmra.mrb[8].mxu0 %vm51_vm3, %v48_v36 }
  0x25   :  { %541 = vmatprep.mubr.msk.f32.mxu0 %vm618_vm0, %v619_v4 }
  0x28   :  { %542 = vmatmul.mubr.msk.f32.gmra.mrb[10].mxu0 %vm51_vm3, %v49_v37 }
  0x29   :  { %544 = vmatprep.mubr.msk.f32.mxu0 %vm618_vm0, %v619_v4 }
  0x2c   :  { %545 = vmatmul.mubr.msk.f32.gmra.mrb[12].mxu0 %vm51_vm3, %v50_v38 }
  0x2d   :  { %551 = vmatprep.mubr.msk.f32.mxu0 %vm618_vm0, %v619_v4 }
  0x30   :  { %552 = vmatmul.mubr.msk.f32.vlgmr.msra.gmra.mrb[14].mxu0 %vm181_vm1, %v669_v6 }
  0x31   :  { %554 = vmatprep.mubr.msk.f32.mxu0 %vm618_vm0, %v619_v4 }
  0x34   :  { %555 = vmatmul.mubr.msk.f32.gmra.mrb[16].mxu0 %vm181_vm1, %v679_v9 }
  0xdf   :  { %v278_v39 = vpop.f32.mrb[0].mxu1 }
  0xe0   :  { %v559_v40 = vpop.f32.mrb[1].mxu1 }
  0xe3   :  { %v283_v41 = vpop.f32.mrb[2].mxu1 }
  0xe4   :  { %v562_v42 = vpop.f32.mrb[3].mxu1 }
  0xe7   :  { %v143_v43 = vpop.f32.mrb[0].mxu0 }
  0xe8   :  { %v528_v44 = vpop.f32.mrb[1].mxu0  ;;  %577 = vmatmul.mubr.msk.f32.vlgmr.msra.gmra.mrb[10].mxu1 %vm181_vm1, %v143_v43 }
  0xe9   :  { %579 = vmatprep.mubr.msk.f32.mxu1 %vm618_vm0, %v619_v4  ;;  %v288_v45 = vpop.f32.mrb[4].mxu1 }
  0xea   :  { %v565_v46 = vpop.f32.mrb[5].mxu1 }
  0xeb   :  { %v148_v47 = vpop.f32.mrb[2].mxu0 }
  0xec   :  { %v531_v48 = vpop.f32.mrb[3].mxu0  ;;  %580 = vmatmul.mubr.msk.f32.gmra.mrb[12].mxu1 %vm181_vm1, %v148_v47 }
  0xed   :  { %582 = vmatprep.mubr.msk.f32.mxu1 %vm618_vm0, %v619_v4  ;;  %v293_v49 = vpop.f32.mrb[6].mxu1 }
  0xee   :  { %v568_v50 = vpop.f32.mrb[7].mxu1 }
  0xef   :  { %v153_v51 = vpop.f32.mrb[4].mxu0 }
  0xf0   :  { %v534_v52 = vpop.f32.mrb[5].mxu0  ;;  %583 = vmatmul.mubr.msk.f32.gmra.mrb[14].mxu1 %vm181_vm1, %v153_v51 }
  0xf1   :  { %585 = vmatprep.mubr.msk.f32.mxu1 %vm618_vm0, %v619_v4  ;;  %v298_v53 = vpop.f32.mrb[8].mxu1 }
  0xf2   :  { %v571_v54 = vpop.f32.mrb[9].mxu1 }
  0xf3   :  { %v158_v55 = vpop.f32.mrb[6].mxu0 }
  0xf4   :  { %v537_v56 = vpop.f32.mrb[7].mxu0  ;;  %586 = vmatmul.mubr.msk.f32.gmra.mrb[16].mxu1 %vm181_vm1, %v158_v55 }
  0xf5   :  { %588 = vmatprep.mubr.msk.f32.mxu1 %vm618_vm0, %v619_v4 }
  0xf7   :  { %v163_v57 = vpop.f32.mrb[8].mxu0 }
  0xf8   :  { %v540_v58 = vpop.f32.mrb[9].mxu0  ;;  %589 = vmatmul.mubr.msk.f32.gmra.mrb[18].mxu1 %vm181_vm1, %v163_v57 }
  0xf9   :  { %591 = vmatprep.mubr.msk.f32.mxu1 %vm618_vm0, %v619_v4 }
  0xfb   :  { %v168_v59 = vpop.f32.mrb[10].mxu0 }
  0xfc   :  { %v543_v60 = vpop.f32.mrb[11].mxu0  ;;  %592 = vmatmul.mubr.msk.f32.gmra.mrb[20].mxu1 %vm181_vm1, %v168_v59 }
  0xfd   :  { %594 = vmatprep.mubr.msk.f32.mxu1 %vm618_vm0, %v619_v4 }
  0xff   :  { %v173_v61 = vpop.f32.mrb[12].mxu0 }
 0x100   :  { %v546_v62 = vpop.f32.mrb[13].mxu0  ;;  %595 = vmatmul.mubr.msk.f32.gmra.mrb[22].mxu1 %vm181_vm1, %v173_v61 }
 0x103   :  { %v268_v63 = vpop.f32.mrb[14].mxu0 }
 0x104   :  { %v553_v0 = vpop.f32.mrb[15].mxu0 }
 0x107   :  { %v273_v1 = vpop.f32.mrb[16].mxu0 }
 0x108   :  { %v556_v2 = vpop.f32.mrb[17].mxu0 }
 0x1bb   :  { %v389_v3 = vpop.f32.mrb[10].mxu1 }
 0x1bc   :  { %v390_v6 = vadd.f32 %v389_v3, %v268_v63  ;;  %v578_v7 = vpop.f32.mrb[11].mxu1 }
 0x1be   :  { %v430_v8 = vadd.f32 %v479_v5, %v390_v6 }
 0x1bf   :  { %v394_v9 = vpop.f32.mrb[12].mxu1 }
 0x1c0   :  { %v437_v10 = vmax.f32 %v430_v8, 0.0  ;;  %v395_v4 = vadd.f32 %v394_v9, %v273_v1  ;;  %v581_v11 = vpop.f32.mrb[13].mxu1 }
 0x1c2   :  { %445 = vst.msk [vmem:[%s838_s6] sm:$0xff] %vm444_vm4, %v437_v10  ;;  %v431_v12 = vadd.f32 %v479_v5, %v395_v4 }
 0x1c3   :  { %v399_v13 = vpop.f32.mrb[14].mxu1 }
 0x1c4   :  { %v438_v14 = vmax.f32 %v431_v12, 0.0  ;;  %v400_v15 = vadd.f32 %v399_v13, %v278_v39  ;;  %v584_v16 = vpop.f32.mrb[15].mxu1 }
 0x1c6   :  { %446 = vst.msk [vmem:[%s838_s6 + $0x8] sm:$0xff] %vm444_vm4, %v438_v14  ;;  %v432_v17 = vadd.f32 %v479_v5, %v400_v15 }
 0x1c7   :  { %v404_v18 = vpop.f32.mrb[16].mxu1 }
 0x1c8   :  { %v439_v19 = vmax.f32 %v432_v17, 0.0  ;;  %v405_v20 = vadd.f32 %v404_v18, %v283_v41  ;;  %v587_v21 = vpop.f32.mrb[17].mxu1 }
 0x1ca   :  { %447 = vst.msk [vmem:[%s838_s6 + $0x10] sm:$0xff] %vm444_vm4, %v439_v19  ;;  %v433_v22 = vadd.f32 %v479_v5, %v405_v20 }
 0x1cb   :  { %v409_v23 = vpop.f32.mrb[18].mxu1 }
 0x1cc   :  { %v440_v24 = vmax.f32 %v433_v22, 0.0  ;;  %v410_v25 = vadd.f32 %v409_v23, %v288_v45  ;;  %v590_v26 = vpop.f32.mrb[19].mxu1 }
 0x1ce   :  { %448 = vst.msk [vmem:[%s838_s6 + $0x18] sm:$0xff] %vm444_vm4, %v440_v24  ;;  %v434_v27 = vadd.f32 %v479_v5, %v410_v25 }
 0x1cf   :  { %v414_v28 = vpop.f32.mrb[20].mxu1 }
 0x1d0   :  { %v441_v29 = vmax.f32 %v434_v27, 0.0  ;;  %v415_v30 = vadd.f32 %v414_v28, %v293_v49  ;;  %v593_v31 = vpop.f32.mrb[21].mxu1 }
 0x1d2   :  { %449 = vst.msk [vmem:[%s838_s6 + $0x20] sm:$0xff] %vm444_vm4, %v441_v29  ;;  %v435_v32 = vadd.f32 %v479_v5, %v415_v30 }
 0x1d3   :  { %v419_v33 = vpop.f32.mrb[22].mxu1 }
 0x1d4   :  { %v442_v34 = vmax.f32 %v435_v32, 0.0  ;;  %v420_v35 = vadd.f32 %v419_v33, %v298_v53  ;;  %v596_v36 = vpop.f32.mrb[23].mxu1 }
 0x1d6   :  { %450 = vst.msk [vmem:[%s838_s6 + $0x28] sm:$0xff] %vm444_vm4, %v442_v34  ;;  %v436_v37 = vadd.f32 %v479_v5, %v420_v35 }
 0x1d8   :  { %v443_v38 = vmax.f32 %v436_v37, 0.0 }
 0x1da   :  { %452 = vst.msk [vmem:[%s838_s6 + $0x30] sm:$0xf] %vm451_vm5, %v443_v38 }

// kernel: net_forward.9
= control target key start
LH: loop header
LB: loop body
LE: loop exit
PB: predicated region body
PF: predicated region fallthrough
CT: control target
= control target key end

     0   :  { %s1123_s27 = smov 0   ;;  %s1280_s0 = inlined_call_operand.vmem [shape: f32[64,64], index: 0, kind: input, shape index: {}]   ;;  %s1281_s1 = inlined_call_operand.vmem [shape: f32[64,32], index: 1, kind: input, shape index: {}]   ;;  %s1282_s2 = inlined_call_operand.vmem [shape: f32[64,32], index: 2, kind: input, shape index: {}]   ;;  %s1283_s3 = inlined_call_operand.vmem [shape: f32[32,8], index: 3, kind: input, shape index: {}]   ;;  %s1284_s4 = inlined_call_operand.vmem [shape: f32[32,8], index: 4, kind: input, shape index: {}]   ;;  %s1285_s5 = inlined_call_operand.vmem [shape: f32[1,8], index: 5, kind: input, shape index: {}]   ;;  %s1286_s6 = inlined_call_operand.vmem [shape: f32[8,4], index: 6, kind: input, shape index: {}]   ;;  %s1287_s7 = inlined_call_operand.vmem [shape: f32[1,4], index: 7, kind: input, shape index: {}]   ;;  %s1288_s8 = inlined_call_operand.vmem [shape: f32[64,4], index: 8, kind: output, shape index: {}]  }
   0x1 LB: > { %s887_s28 = sadd.s32 4294967295, %s1076_s27   ;;  %p891_p0 = scmp.ge.s32.totalorder %s1076_s27, 1  ;;  %s1076_s27 = sphi %s1123_s27, %s18_s27  }
   0x2   : > { %p263_p1 = scmp.lt.s32.totalorder %s1076_s27, 3 }
   0x4   : > { %p264_p2 = pnand %p891_p0, %p263_p1 }
   0x5   : > { %v309_v0 = vld [vmem:[%s1281_s1] sm:$0xff] (!%p264_p2)  ;;  %v310_v1 = vld [vmem:[%s1281_s1 + $0x8] sm:$0xff] (!%p264_p2)  ;;  %s892_s13 = sshll.u32 (!%p264_p2), %s887_s28, 2  ;;  %s1140_s14 = sshll.u32 (!%p264_p2), %s887_s28, 5  ;;  %v311_v5 = vld [vmem:[%s1281_s1 + $0x10] sm:$0xff] (!%p264_p2)  ;;  %vm352_vm0 = vcmask (!%p264_p2), 523264  }
   0x6   : > { %267 = sbr.rel (%p264_p2) target bundleno = 999 (0x3e7), region = 52  ;;  %v317_v2 = vld [vmem:[%s1282_s2] sm:$0xff] (!%p264_p2)  ;;  %v318_v3 = vld [vmem:[%s1282_s2 + $0x8] sm:$0xff] (!%p264_p2)  ;;  %v312_v6 = vld [vmem:[%s1281_s1 + $0x18] sm:$0xff] (!%p264_p2)  ;;  %p298_p3 = scmp.lt.s32.totalorder (!%p264_p2), %s892_s13, 7  ;;  %vm458_vm1 = vcmask (!%p264_p2), 261120  }
   0x7   : > { %v325_v4 = vadd.f32 (!%p264_p2), %v317_v2, %v309_v0  ;;  %v326_v7 = vadd.f32 (!%p264_p2), %v318_v3, %v310_v1  ;;  %v319_v8 = vld [vmem:[%s1282_s2 + $0x10] sm:$0xff] (!%p264_p2)  ;;  %v320_v9 = vld [vmem:[%s1282_s2 + $0x18] sm:$0xff] (!%p264_p2)  ;;  %v313_v10 = vld [vmem:[%s1281_s1 + $0x20] sm:$0xff] (!%p264_p2)  ;;  %s1164_s30 = scalar_lea.vmem (!%p264_p2), %s1281_s1, %s1140_s14  ;;  %s1200_s12 = scalar_lea.vmem (!%p264_p2), %s1282_s2, %s1140_s14  ;;  %vm676_vm2 = vcmask (!%p264_p2), 64512   ;;  %vm774_vm3 = vcmask (!%p264_p2), 31744  }
   0x8   : > { %v327_v11 = vadd.f32 (!%p264_p2), %v319_v8, %v311_v5  ;;  %v328_v12 = vadd.f32 (!%p264_p2), %v320_v9, %v312_v6  ;;  %v314_v13 = vld [vmem:[%s1281_s1 + $0x28] sm:$0xff] (!%p264_p2)  ;;  %v321_v14 = vld [vmem:[%s1282_s2 + $0x20] sm:$0xff] (!%p264_p2)  ;;  %v315_v19 = vld [vmem:[%s1281_s1 + $0x30] sm:$0xff] (!%p264_p2) }
   0x9   : > { %v322_v15 = vld [vmem:[%s1282_s2 + $0x28] sm:$0xff] (!%p264_p2)  ;;  %v1008_v16 = vpack.c.bf16 (!%p264_p2), %v326_v7, %v325_v4  ;;  %v329_v17 = vadd.f32 (!%p264_p2), %v321_v14, %v313_v10  ;;  %v316_v20 = vld [vmem:[%s1281_s1 + $0x38] sm:$0xff] (!%p264_p2)  ;;  %v323_v21 = vld [vmem:[%s1282_s2 + $0x30] sm:$0xff] (!%p264_p2) }
   0xa   : > { %v330_v18 = vadd.f32 (!%p264_p2), %v322_v15, %v314_v13  ;;  %v1012_v22 = vpack.c.bf16 (!%p264_p2), %v328_v12, %v327_v11  ;;  %v324_v23 = vld [vmem:[%s1282_s2 + $0x38] sm:$0xff] (!%p264_p2)  ;;  %v454_v24 = vld [vmem:[%s1284_s4] sm:$0xff] (!%p264_p2)  ;;  %v455_v25 = vld [vmem:[%s1284_s4 + $0x8] sm:$0xff] (!%p264_p2)  ;;  %v331_v33 = vadd.f32 (!%p264_p2), %v323_v21, %v315_v19 }
   0xb   : > { %1009 = vmatprep.subr.bf16.mxu0 (!%p264_p2), %v1008_v16  ;;  %v1024_v26 = vpack.c.bf16 (!%p264_p2), %v455_v25, %v454_v24  ;;  %v456_v27 = vld [vmem:[%s1284_s4 + $0x10] sm:$0xff] (!%p264_p2)  ;;  %v457_v28 = vld [vmem:[%s1284_s4 + $0x18] sm:$0xff] (!%p264_p2)  ;;  %v335_v29 = vld [vmem:[%s1164_s30] sm:$0xff] (!%p264_p2)  ;;  %v332_v34 = vadd.f32 (!%p264_p2), %v324_v23, %v316_v20 }
   0xc   : > { %1011 = vmatpush3.bf16.msra.mxu0 (!%p264_p2), %v1008_v16  ;;  %v1028_v31 = vpack.c.bf16 (!%p264_p2), %v457_v28, %v456_v27  ;;  %v1016_v32 = vpack.c.bf16 (!%p264_p2), %v330_v18, %v329_v17  ;;  %v340_v35 = vld [vmem:[%s1200_s12] sm:$0xff] (!%p264_p2)  ;;  %v451_v38 = vld [vmem:[%s1283_s3 + $0x8] sm:$0xff] (!%p264_p2)  ;;  %v337_v42 = vld [vmem:[%s1164_s30 + $0x10] sm:$0xff] (!%p264_p2) }
   0xd   : > { %s1290_s13 = smov (!%p298_p3, %s892_s13), 7  ;;  %1013 = vmatprep.subr.bf16.mxu0 %v1012_v22  ;;  %v450_v36 = vld [vmem:[%s1283_s3] sm:$0xff]  ;;  %1025 = vmatprep.subr.bf16.mxu1 %v1024_v26  ;;  %v344_v37 = vadd.f32 %v340_v35, %v335_v29  ;;  %v336_v39 = vld [vmem:[%s1164_s30 + $0x8] sm:$0xff]  ;;  %v342_v43 = vld [vmem:[%s1200_s12 + $0x10] sm:$0xff]  ;;  %v1020_v44 = vpack.c.bf16 %v332_v34, %v331_v33 }
   0xe   : > { %s893_s25 = sshll.u32 %s1290_s13, 3  ;;  %1027 = vmatpush3.bf16.msra.mxu1 %v1024_v26  ;;  %v341_v40 = vld [vmem:[%s1200_s12 + $0x8] sm:$0xff]  ;;  %v1032_v41 = vpack.c.bf16 %v451_v38, %v450_v36  ;;  %v452_v45 = vld [vmem:[%s1283_s3 + $0x10] sm:$0xff]  ;;  %v453_v46 = vld [vmem:[%s1283_s3 + $0x18] sm:$0xff]  ;;  %v346_v48 = vadd.f32 %v342_v43, %v337_v42 }
   0xf   : > { %s1207_s17 = scalar_lea.vmem %s1280_s0, %s893_s25  ;;  %1029 = vmatprep.subr.bf16.mxu1 %v1028_v31  ;;  %980 = vmatprep.mubr.msk.f32.mxu1 %vm458_vm1, %v344_v37  ;;  %v345_v47 = vadd.f32 %v341_v40, %v336_v39  ;;  %v338_v49 = vld [vmem:[%s1164_s30 + $0x18] sm:$0xff]  ;;  %v1036_v51 = vpack.c.bf16 %v453_v46, %v452_v45  ;;  %v668_v56 = vld [vmem:[%s1286_s6] sm:$0xff]  ;;  %s307_s19 = scalar_lea.vmem %s1288_s8, %s893_s25 }
  0x10   : > { %v348_v30 = vld [vmem:[%s1207_s17] sm:$0xff]  ;;  %1015 = vmatpush3.bf16.msra.mxu0 %v1012_v22  ;;  %v343_v50 = vld [vmem:[%s1200_s12 + $0x18] sm:$0xff]  ;;  %v349_v53 = vld [vmem:[%s1207_s17 + $0x8] sm:$0xff] }
  0x11   : > { %966 = vmatprep.mubr.msk.f32.mxu0 %vm352_vm0, %v348_v30  ;;  %1017 = vmatprep.subr.bf16.mxu0 %v1016_v32  ;;  %v347_v52 = vadd.f32 %v343_v50, %v338_v49  ;;  %v350_v54 = vld [vmem:[%s1207_s17 + $0x10] sm:$0xff]  ;;  %v351_v55 = vld [vmem:[%s1207_s17 + $0x18] sm:$0xff]  ;;  %v909_v61 = vld [vmem:[%s1285_s5] ss:$0 sm:$0xff] }
  0x12   : > { %1031 = vmatpush3.bf16.msra.mxu1 %v1028_v31  ;;  %v910_v10 = vld [vmem:[%s1287_s7] ss:$0 sm:$0xff] }
  0x13   : > { %1033 = vmatprep.subr.bf16.mxu1 %v1032_v41 }
  0x14   : > { %1019 = vmatpush3.bf16.msra.mxu0 %v1016_v32 }
  0x15   : > { %1021 = vmatprep.subr.bf16.mxu0 %v1020_v44  ;;  %981 = vmatmul.mubr.msk.f32.vlgmr.msra.gmra.mrb[0].mxu1 %vm458_vm1, %v345_v47 }
  0x16   : > { %1035 = vmatpush3.bf16.msra.mxu1 %v1032_v41  ;;  %983 = vmatprep.mubr.msk.f32.mxu1 %vm458_vm1, %v346_v48 }
  0x17   : > { %1037 = vmatprep.subr.bf16.mxu1 %v1036_v51 }
  0x18   : > { %1023 = vmatpush3.bf16.msra.mxu0 %v1020_v44 }
  0x19   : > { %984 = vmatmul.mubr.msk.f32.gmra.mrb[2].mxu1 %vm458_vm1, %v347_v52  ;;  %1000 = vmatprep.subr.mxu0 %v668_v56 }
  0x1a   : > { %1039 = vmatpush3.bf16.msra.mxu1 %v1036_v51 }
  0x1b   : > { %967 = vmatmul.mubr.msk.f32.vlgmr.msra.gmra.mrb[0].mxu0 %vm352_vm0, %v349_v53  ;;  %1040 = vmatprep.subr.mxu1 %v668_v56 }
  0x1c   : > { %969 = vmatprep.mubr.msk.f32.mxu0 %vm352_vm0, %v350_v54  ;;  %1001 = vmatpush3.msra.mxu0 %v668_v56 }
  0x1f   : > { %970 = vmatmul.mubr.msk.f32.gmra.mrb[2].mxu0 %vm352_vm0, %v351_v55 }
  0xee   : > { %v968_v57 = vpop.f32.mrb[0].mxu0 }
  0xef   : > { %v431_v58 = vpop.f32.mrb[1].mxu0 }
  0xf0   : > { %994 = vmatprep.mubr.msk.f32.mxu1 %vm458_vm1, %v431_v58 }
  0xf1   : > { %995 = vmatmul.mubr.msk.f32.vlgmr.msra.gmra.mrb[0].mxu1 %vm458_vm1, %v968_v57 }
  0xf2   : > { %v971_v59 = vpop.f32.mrb[2].mxu0  ;;  %1041 = vmatpush3.msra.mxu1 %v668_v56 }
  0xf3   : > { %v441_v60 = vpop.f32.mrb[3].mxu0 }
  0xf4   : > { %997 = vmatprep.mubr.msk.f32.mxu1 %vm458_vm1, %v441_v60 }
  0xf5   : > { %998 = vmatmul.mubr.msk.f32.gmra.mrb[2].mxu1 %vm458_vm1, %v971_v59 }
 0x1c4   : > { %v996_v62 = vpop.f32.mrb[0].mxu1 }
 0x1c5   : > { %v661_v63 = vadd.f32 %v996_v62, %v909_v61  ;;  %v634_v0 = vpop.f32.mrb[1].mxu1 }
 0x1c6   : > { %v660_v1 = vadd.f32 %v909_v61, %v634_v0 }
 0x1c7   : > { %v665_v4 = vmax.f32 %v661_v63, 0.0 }
 0x1c8   : > { %v664_v2 = vmax.f32 %v660_v1, 0.0  ;;  %v999_v3 = vpop.f32.mrb[2].mxu1 }
 0x1c9   : > { %v663_v5 = vadd.f32 %v999_v3, %v909_v61  ;;  %v644_v6 = vpop.f32.mrb[3].mxu1 }
 0x1ca   : > { %v662_v7 = vadd.f32 %v909_v61, %v644_v6  ;;  %1002 = vmatprep.mubr.msk.f32.mxu0 %vm676_vm2, %v664_v2 }
 0x1cb   : > { %1003 = vmatmul.mubr.msk.f32.vlgmr.msra.gmra.mrb[4].mxu0 %vm676_vm2, %v665_v4  ;;  %v667_v9 = vmax.f32 %v663_v5, 0.0 }
 0x1cc   : > { %v666_v8 = vmax.f32 %v662_v7, 0.0 }
 0x1ce   : > { %1005 = vmatprep.mubr.msk.f32.mxu1 %vm676_vm2, %v666_v8 }
 0x1cf   : > { %1006 = vmatmul.mubr.msk.f32.vlgmr.msra.gmra.mrb[4].mxu1 %vm676_vm2, %v667_v9 }
 0x29e   : > { %v1004_v11 = vpop.f32.mrb[4].mxu0 }
 0x29f   : > { %v755_v12 = vpop.f32.mrb[5].mxu0  ;;  %v761_v14 = vadd.f32 %v1004_v11, %v910_v10 }
 0x2a0   : > { %v756_v13 = vadd.f32 %v910_v10, %v755_v12 }
 0x2a1   : > { %v778_v20 = vsel %vm774_vm3, %v761_v14, -inf }
 0x2a2   : > { %v1007_v15 = vpop.f32.mrb[4].mxu1  ;;  %v775_v16 = vsel %vm774_vm3, %v756_v13, -inf }
 0x2a3   : > { %776 = vmax.xlane.f32.xlu0 %v775_v16  ;;  %v765_v17 = vpop.f32.mrb[5].mxu1  ;;  %v771_v19 = vadd.f32 %v1007_v15, %v910_v10 }
 0x2a4   : > { %v766_v18 = vadd.f32 %v910_v10, %v765_v17 }
 0x2a5   : > { %v784_v22 = vsel %vm774_vm3, %v771_v19, -inf }
 0x2a6   : > { %v781_v21 = vsel %vm774_vm3, %v766_v18, -inf }
 0x2a7   : > { %779 = vmax.xlane.f32.xlu0 %v778_v20  ;;  %782 = vmax.xlane.f32.xlu1 %v781_v21 }
 0x2ab   : > { %785 = vmax.xlane.f32.xlu1 %v784_v22 }
 0x330   : > { %v777_v23 = vpop.xlane.xlu0 %776 }
 0x331   : > { %v787_v24 = vsub.f32 %v756_v13, %v777_v23 }
 0x333   : > { %v791_v25 = vmul.f32 1.442695, %v787_v24 }
 0x334   : > { %v780_v26 = vpop.xlane.xlu0 %779  ;;  %v783_v27 = vpop.xlane.xlu1 %782 }
 0x335   : > { %1054 = vpow2.f32 %v791_v25  ;;  %v788_v28 = vsub.f32 %v761_v14, %v780_v26  ;;  %v789_v29 = vsub.f32 %v766_v18, %v783_v27 }
 0x337   : > { %v793_v30 = vmul.f32 1.442695, %v788_v28  ;;  %v795_v31 = vmul.f32 1.442695, %v789_v29 }
 0x338   : > { %v786_v32 = vpop.xlane.xlu1 %785 }
 0x339   : > { %1056 = vpow2.f32 %v793_v30  ;;  %v790_v33 = vsub.f32 %v771_v19, %v786_v32 }
 0x33a   : > { %1058 = vpow2.f32 %v795_v31 }
 0x33b   : > { %v797_v34 = vmul.f32 1.442695, %v790_v33 }
 0x33d   : > { %1060 = vpow2.f32 %v797_v34 }
 0x33f   : > { %v1055_v35 = vpop.eup %1054 }
 0x340   : > { %v799_v36 = vsel %vm774_vm3, %v1055_v35, 0.0 }
 0x341   : > { %800 = vadd.xlane.f32.xlu0 %v799_v36 }
 0x343   : > { %v1057_v37 = vpop.eup %1056 }
 0x344   : > { %v1059_v38 = vpop.eup %1058  ;;  %v802_v39 = vsel %vm774_vm3, %v1057_v37, 0.0 }
 0x345   : > { %803 = vadd.xlane.f32.xlu1 %v802_v39  ;;  %v805_v40 = vsel %vm774_vm3, %v1059_v38, 0.0 }
 0x346   : > { %806 = vadd.xlane.f32.xlu0 %v805_v40 }
 0x347   : > { %v1061_v41 = vpop.eup %1060 }
 0x348   : > { %v808_v42 = vsel %vm774_vm3, %v1061_v41, 0.0 }
 0x349   : > { %809 = vadd.xlane.f32.xlu1 %v808_v42 }
 0x3ce   : > { %v801_v43 = vpop.xlane.xlu0 %800 }
 0x3cf   : > { %1062 = vlog2.f32 %v801_v43 }
 0x3d2   : > { %v804_v44 = vpop.xlane.xlu1 %803 }
 0x3d3   : > { %v807_v45 = vpop.xlane.xlu0 %806  ;;  %1064 = vlog2.f32 %v804_v44 }
 0x3d4   : > { %1066 = vlog2.f32 %v807_v45 }
 0x3d6   : > { %v810_v46 = vpop.xlane.xlu1 %809 }
 0x3d7   : > { %1068 = vlog2.f32 %v810_v46 }
 0x3d9   : > { %v1063_v47 = vpop.eup %1062 }
 0x3da   : > { %v812_v48 = vmul.f32 0.6931472, %v1063_v47 }
 0x3dc   : > { %v819_v49 = vsub.f32 %v787_v24, %v812_v48 }
 0x3dd   : > { %v1065_v50 = vpop.eup %1064 }
 0x3de   : > { %v1067_v51 = vpop.eup %1066  ;;  %823 = vst.msk [vmem:[%s307_s19] sm:$0xff] %vm774_vm3, %v819_v49  ;;  %v814_v52 = vmul.f32 0.6931472, %v1065_v50 }
 0x3df   : > { %v816_v53 = vmul.f32 0.6931472, %v1067_v51 }
 0x3e0   : > { %v820_v54 = vsub.f32 %v788_v28, %v814_v52 }
 0x3e1   : > { %v1069_v55 = vpop.eup %1068  ;;  %v821_v56 = vsub.f32 %v789_v29, %v816_v53 }
 0x3e2   : > { %824 = vst.msk [vmem:[%s307_s19 + $0x8] sm:$0xff] %vm774_vm3, %v820_v54  ;;  %v818_v57 = vmul.f32 0.6931472, %v1069_v55 }
 0x3e3   : > { %825 = vst.msk [vmem:[%s307_s19 + $0x10] sm:$0xff] %vm774_vm3, %v821_v56 }
 0x3e4   : > { %v822_v58 = vsub.f32 %v790_v33, %v818_v57 }
 0x3e6   : > { %826 = vst.msk [vmem:[%s307_s19 + $0x18] sm:$0xff] %vm774_vm3, %v822_v58 }
 0x3e7 PF: > { %s18_s27 = sadd.s32 1, %s1076_s27  }
 0x3e8   : > { %p15_p4 = scmp.ge.s32.totalorder %s18_s27, 4  }
 0x3ea   :  { %17 = sbr.rel (!%p15_p4) target bundleno = 1 (0x1), region = 84 }

</bundles_post_ra>
